<compile_context>
chip_gen: v7x
topology: tpu7x:2x2x1
jax: 0.10.0
libtpu: 0.0.40
codegen_flags: <defaults>
</compile_context>

<pallas_src>
import functools

import jax
import jax.numpy as jnp
from jax.experimental import pallas as pl
from jax.experimental.pallas import tpu as pltpu


def _conv_in_lrelu_kernel(x_ref, w_ref, o_ref, acc_ref, *, c_store, eps, slope):
    # x_ref : (1, M, Kt)   bf16  -- im2col'd input tile (voxels x taps*cin)
    # w_ref : (Kt, Ct)     bf16  -- weight tile (taps*cin x padded out-channels)
    # o_ref : (1, c_store, M) f32 -- lane-dense output (spatial on lanes)
    # acc_ref: (M, Ct)     f32   -- VMEM accumulator, persists across K steps
    k = pl.program_id(2)

    @pl.when(k == 0)
    def _init():
        acc_ref[...] = jnp.zeros_like(acc_ref)

    # (M, Kt) @ (Kt, Ct): M output voxels stream through each MXU weight tile.
    acc_ref[...] += jnp.dot(x_ref[0], w_ref[...],
                            preferred_element_type=jnp.float32)

    @pl.when(k == pl.num_programs(2) - 1)
    def _finalize():
        y = acc_ref[...]                                    # (M, Ct) f32
        inv_m = 1.0 / float(y.shape[0])
        # Per-channel InstanceNorm stats over the spatial (sublane) axis.
        mean = jnp.sum(y, axis=0, keepdims=True) * inv_m    # (1, Ct)
        ex2 = jnp.sum(y * y, axis=0, keepdims=True) * inv_m
        var = jnp.maximum(ex2 - mean * mean, 0.0)
        inv = jax.lax.rsqrt(var + eps)
        # Single streaming pass: normalize + LeakyReLU.
        yn = (y - mean) * inv
        yn = jnp.where(yn >= 0.0, yn, slope * yn)
        # Tile-aligned XLU transpose -> lane-dense (Ct, M) store; drop the
        # zero-padded channels (they never reach HBM, stats unaffected).
        o_ref[0] = yn.T[:c_store, :].astype(o_ref.dtype)


def _channel_tiling(cout):
    """Returns (ct_mm, n_ct, c_store): matmul lane-tile width, #channel tiles,
    real channels stored per tile."""
    if cout % 256 == 0:            # v6e/v7x MXU-width tiles (v5e: 128 also fine)
        return 256, cout // 256, 256
    if cout % 128 == 0:
        return 128, cout // 128, 128
    # Small / ragged Cout: one tile, pad the matmul lanes up to 128-multiple.
    ct_mm = max(128, ((cout + 127) // 128) * 128)
    return ct_mm, 1, cout


def _k_tiling(K):
    """Innermost reduction tile: >=2 grid steps when possible, 128-lane aligned."""
    for kt in (512, 256, 128):
        if K % kt == 0 and K // kt >= 2:
            return kt
    return K


def unet_mid_start(x, weight, *, eps=1e-5, negative_slope=0.01):
    """x: (N, Cin, D, H, W) f32; weight: (Cout, Cin, 4, 4, 4) f32 (PyTorch layout).
    Returns (N, Cout, D//2, H//2, W//2) f32."""
    N, cin, D, H, W = x.shape
    cout = weight.shape[0]
    assert weight.shape[1:] == (cin, 4, 4, 4), weight.shape
    assert D % 2 == 0 and H % 2 == 0 and W % 2 == 0, "k=4,s=2,p=1 needs even dims"
    Do, Ho, Wo = D // 2, H // 2, W // 2
    M = Do * Ho * Wo
    K = 64 * cin
    # Lane-dense output / native epilogue transpose.  For other spatial sizes,
    # pad M to a 128-multiple and mask the padded voxels out of the stats.
    assert M % 128 == 0, M

    # --- im2col (layout plumbing, done once, in bf16, channels-last) ---------
    xpad = jnp.pad(x.astype(jnp.bfloat16),
                   ((0, 0), (0, 0), (1, 1), (1, 1), (1, 1)))
    xpad = jnp.transpose(xpad, (0, 2, 3, 4, 1))          # (N, D+2, H+2, W+2, Cin)
    cols = []
    for kd in range(4):
        for kh in range(4):
            for kw in range(4):
                cols.append(xpad[:, kd:kd + 2 * Do:2, kh:kh + 2 * Ho:2,
                                 kw:kw + 2 * Wo:2, :])   # (N, Do, Ho, Wo, Cin)
    xcol = jnp.stack(cols, axis=4)                       # (N, Do, Ho, Wo, 64, Cin)
    xcol = xcol.reshape(N, M, K)                         # K index = tap*Cin + ci

    # --- weight -> (K, Cout_padded), K index = ((kd*4+kh)*4+kw)*Cin + ci -----
    ct_mm, n_ct, c_store = _channel_tiling(cout)
    wmat = jnp.transpose(weight, (2, 3, 4, 1, 0)).reshape(K, cout)
    if n_ct * ct_mm != cout:
        wmat = jnp.pad(wmat, ((0, 0), (0, n_ct * ct_mm - cout)))
    wmat = wmat.astype(jnp.bfloat16)

    Kt = _k_tiling(K)
    n_k = K // Kt

    kernel = functools.partial(_conv_in_lrelu_kernel,
                               c_store=c_store, eps=eps, slope=negative_slope)

    out = pl.pallas_call(
        kernel,
        out_shape=jax.ShapeDtypeStruct((N, cout, M), jnp.float32),
        grid=(N, n_ct, n_k),
        in_specs=[
            pl.BlockSpec((1, M, Kt), lambda n, c, k: (n, 0, k)),
            pl.BlockSpec((Kt, ct_mm), lambda n, c, k: (k, c)),
        ],
        out_specs=pl.BlockSpec((1, c_store, M), lambda n, c, k: (n, c, 0)),
        scratch_shapes=[pltpu.VMEM((M, ct_mm), jnp.float32)],
        compiler_params=pltpu.CompilerParams(
            dimension_semantics=("parallel", "parallel", "arbitrary"),
            vmem_limit_bytes=32 * 1024 * 1024,
        ),
    )(xcol, wmat)

    # (N, Cout, M) -> (N, Cout, Do, Ho, Wo): plain reshape, no extra HBM pass.
    return out.reshape(N, cout, Do, Ho, Wo)


def ref_forward(x, weight, eps=1e-5, negative_slope=0.01):
    """Pure-JAX reference with the same bf16-operand / f32-accumulate numerics."""
    y = jax.lax.conv_general_dilated(
        x.astype(jnp.bfloat16), weight.astype(jnp.bfloat16),
        window_strides=(2, 2, 2),
        padding=((1, 1), (1, 1), (1, 1)),
        dimension_numbers=('NCDHW', 'OIDHW', 'NCDHW'),
        preferred_element_type=jnp.float32)
    mean = y.mean(axis=(2, 3, 4), keepdims=True)
    var = y.var(axis=(2, 3, 4), keepdims=True)
    yn = (y - mean) * jax.lax.rsqrt(var + eps)
    return jnp.where(yn >= 0.0, yn, negative_slope * yn)


if __name__ == "__main__":
    key = jax.random.PRNGKey(0)
    k1, k2, k3, k4 = jax.random.split(key, 4)
    N, D, H, W = 2, 16, 16, 16

    # Config 1: small Cout (exercises padded-lane matmul + epilogue transpose).
    cin, cout = 8, 8
    x = jax.random.normal(k1, (N, cin, D, H, W), jnp.float32)
    w = 0.1 * jax.random.normal(k2, (cout, cin, 4, 4, 4), jnp.float32)
    out = jax.block_until_ready(unet_mid_start(x, w))
    ref = ref_forward(x, w)
    assert out.shape == (N, cout, D // 2, H // 2, W // 2), out.shape
    err = float(jnp.max(jnp.abs(out - ref)))
    assert jnp.allclose(out, ref, rtol=2e-3, atol=2e-3), err

    # Config 2: large Cout (exercises multiple 256-wide channel tiles, no pad).
    cin2, cout2 = 4, 512
    x2 = jax.random.normal(k3, (N, cin2, D, H, W), jnp.float32)
    w2 = 0.1 * jax.random.normal(k4, (cout2, cin2, 4, 4, 4), jnp.float32)
    out2 = jax.block_until_ready(unet_mid_start(x2, w2))
    ref2 = ref_forward(x2, w2)
    assert out2.shape == (N, cout2, D // 2, H // 2, W // 2), out2.shape
    err2 = float(jnp.max(jnp.abs(out2 - ref2)))
    assert jnp.allclose(out2, ref2, rtol=2e-3, atol=2e-3), err2

    print("KERNEL_OK")
</pallas_src>

<mosaic_0001>
module attributes {stable_mosaic.version = 11 : i64} {
  func.func @_conv_in_lrelu_kernel(%arg0: i32, %arg1: i32, %arg2: i32, %arg3: memref<1x512x256xbf16, #tpu.memory_space<vmem>>, %arg4: memref<256x128xbf16, #tpu.memory_space<vmem>>, %arg5: memref<1x8x512xf32, #tpu.memory_space<vmem>>, %arg6: memref<512x128xf32, #tpu.memory_space<vmem>>) attributes {dimension_semantics = [#tpu.dimension_semantics<parallel>, #tpu.dimension_semantics<parallel>, #tpu.dimension_semantics<arbitrary>], iteration_bounds = array<i64: 2, 1, 2>, scalar_prefetch = 0 : i64, scratch_operands = 1 : i64, tpu.core_type = #tpu.core_type<tc>, window_params = [{transform_indices = @transform_0, window_bounds = array<i64: 1, 512, 256>}, {transform_indices = @transform_1, window_bounds = array<i64: 256, 128>}, {transform_indices = @transform_2, window_bounds = array<i64: 1, 8, 512>}]} {
    %c0_i32 = arith.constant 0 : i32
    %0 = arith.cmpi eq, %arg2, %c0_i32 : i32
    %1 = arith.extui %0 : i1 to i32
    %c0_i32_0 = arith.constant 0 : i32
    %2 = arith.cmpi ne, %1, %c0_i32_0 : i32
    scf.if %2 {
      %cst_10 = arith.constant 0.000000e+00 : f32
      %13 = vector.broadcast %cst_10 : f32 to vector<512x128xf32>
      %c0_11 = arith.constant 0 : index
      %c0_12 = arith.constant 0 : index
      %14 = vector.load %arg6[%c0_11, %c0_12] : memref<512x128xf32, #tpu.memory_space<vmem>>, vector<512x128xf32>
      tpu.vector_store %arg6[%c0_11, %c0_12], %13 {strides = array<i32>} : memref<512x128xf32, #tpu.memory_space<vmem>>, vector<512x128xf32>,
    } else {
    }
    %c0 = arith.constant 0 : index
    %c0_1 = arith.constant 0 : index
    %3 = vector.load %arg6[%c0, %c0_1] : memref<512x128xf32, #tpu.memory_space<vmem>>, vector<512x128xf32>
    %c0_2 = arith.constant 0 : index
    %c0_3 = arith.constant 0 : index
    %c0_4 = arith.constant 0 : index
    %4 = vector.load %arg3[%c0_2, %c0_3, %c0_4] : memref<1x512x256xbf16, #tpu.memory_space<vmem>>, vector<1x512x256xbf16>
    %5 = vector.shape_cast %4 : vector<1x512x256xbf16> to vector<512x256xbf16>
    %c0_5 = arith.constant 0 : index
    %c0_6 = arith.constant 0 : index
    %6 = vector.load %arg4[%c0_5, %c0_6] : memref<256x128xbf16, #tpu.memory_space<vmem>>, vector<256x128xbf16>
    %cst = arith.constant dense<0.000000e+00> : vector<512x128xf32>
    %7 = tpu.matmul %5, %6, %cst {dimension_numbers = #tpu.dot_dimension_numbers<[1], [0], [0], [1], [0, 0, 1, 1], [], []>} : vector<512x256xbf16>, vector<256x128xbf16>, vector<512x128xf32> -> vector<512x128xf32>
    %8 = arith.addf %3, %7 : vector<512x128xf32>
    %c0_7 = arith.constant 0 : index
    %c0_8 = arith.constant 0 : index
    %9 = vector.load %arg6[%c0_7, %c0_8] : memref<512x128xf32, #tpu.memory_space<vmem>>, vector<512x128xf32>
    tpu.vector_store %arg6[%c0_7, %c0_8], %8 {strides = array<i32>} : memref<512x128xf32, #tpu.memory_space<vmem>>, vector<512x128xf32>,
    %c1_i32 = arith.constant 1 : i32
    %10 = arith.cmpi eq, %arg2, %c1_i32 : i32
    %11 = arith.extui %10 : i1 to i32
    %c0_i32_9 = arith.constant 0 : i32
    %12 = arith.cmpi ne, %11, %c0_i32_9 : i32
    scf.if %12 {
      %c0_10 = arith.constant 0 : index
      %c0_11 = arith.constant 0 : index
      %13 = vector.load %arg6[%c0_10, %c0_11] : memref<512x128xf32, #tpu.memory_space<vmem>>, vector<512x128xf32>
      %cst_12 = arith.constant dense<0.000000e+00> : vector<128xf32>
      %14 = vector.multi_reduction <add>, %13, %cst_12 [0] : vector<512x128xf32> to vector<128xf32>
      %15 = vector.shape_cast %14 : vector<128xf32> to vector<1x128xf32>
      %cst_13 = arith.constant 0.001953125 : f32
      %16 = vector.broadcast %cst_13 : f32 to vector<1x128xf32>
      %17 = arith.mulf %15, %16 : vector<1x128xf32>
      %18 = arith.mulf %13, %13 : vector<512x128xf32>
      %cst_14 = arith.constant dense<0.000000e+00> : vector<128xf32>
      %19 = vector.multi_reduction <add>, %18, %cst_14 [0] : vector<512x128xf32> to vector<128xf32>
      %20 = vector.shape_cast %19 : vector<128xf32> to vector<1x128xf32>
      %cst_15 = arith.constant 0.001953125 : f32
      %21 = vector.broadcast %cst_15 : f32 to vector<1x128xf32>
      %22 = arith.mulf %20, %21 : vector<1x128xf32>
      %23 = arith.mulf %17, %17 : vector<1x128xf32>
      %24 = arith.subf %22, %23 : vector<1x128xf32>
      %cst_16 = arith.constant 0.000000e+00 : f32
      %25 = vector.broadcast %cst_16 : f32 to vector<1x128xf32>
      %26 = arith.maximumf %24, %25 : vector<1x128xf32>
      %cst_17 = arith.constant 9.99999974E-6 : f32
      %27 = vector.broadcast %cst_17 : f32 to vector<1x128xf32>
      %28 = arith.addf %26, %27 : vector<1x128xf32>
      %29 = math.rsqrt %28 : vector<1x128xf32>
      %30 = vector.broadcast %17 : vector<1x128xf32> to vector<512x128xf32>
      %31 = arith.subf %13, %30 : vector<512x128xf32>
      %32 = vector.broadcast %29 : vector<1x128xf32> to vector<512x128xf32>
      %33 = arith.mulf %31, %32 : vector<512x128xf32>
      %cst_18 = arith.constant 0.000000e+00 : f32
      %34 = vector.broadcast %cst_18 : f32 to vector<512x128xf32>
      %35 = arith.cmpf oge, %33, %34 : vector<512x128xf32>
      %cst_19 = arith.constant 0.00999999977 : f32
      %36 = vector.broadcast %cst_19 : f32 to vector<512x128xf32>
      %37 = arith.mulf %36, %33 : vector<512x128xf32>
      %38 = arith.select %35, %33, %37 : vector<512x128xi1>, vector<512x128xf32>
      %39 = tpu.transpose %38, [1, 0] : vector<512x128xf32> -> vector<128x512xf32>
      %40 = vector.extract_strided_slice %39 {offsets = [0, 0], sizes = [8, 512], strides = [1, 1]} : vector<128x512xf32> to vector<8x512xf32>
      %c0_20 = arith.constant 0 : index
      %c0_21 = arith.constant 0 : index
      %c0_22 = arith.constant 0 : index
      %41 = vector.load %arg5[%c0_20, %c0_21, %c0_22] : memref<1x8x512xf32, #tpu.memory_space<vmem>>, vector<1x8x512xf32>
      %42 = vector.shape_cast %41 : vector<1x8x512xf32> to vector<8x512xf32>
      %43 = vector.shape_cast %40 : vector<8x512xf32> to vector<1x8x512xf32>
      tpu.vector_store %arg5[%c0_20, %c0_21, %c0_22], %43 {strides = array<i32>} : memref<1x8x512xf32, #tpu.memory_space<vmem>>, vector<1x8x512xf32>,
    } else {
    }
    return
  }
  func.func @transform_0(%arg0: i32, %arg1: i32, %arg2: i32) -> (i32, i32, i32) {
    %c0_i32 = arith.constant 0 : i32
    %c0_i32_0 = arith.constant 0 : i32
    return %arg0, %c0_i32, %arg2 : i32, i32, i32
  }
  func.func @transform_1(%arg0: i32, %arg1: i32, %arg2: i32) -> (i32, i32) {
    %c0_i32 = arith.constant 0 : i32
    return %arg2, %arg1 : i32, i32
  }
  func.func @transform_2(%arg0: i32, %arg1: i32, %arg2: i32) -> (i32, i32, i32) {
    %c0_i32 = arith.constant 0 : i32
    %c0_i32_0 = arith.constant 0 : i32
    return %arg0, %arg1, %c0_i32 : i32, i32, i32
  }
}

</mosaic_0001>

<bundles_post_ra>
// kernel: tpu_custom_call.1
= control target key start
LH: loop header
LB: loop body
LE: loop exit
PB: predicated region body
PF: predicated region fallthrough
CT: control target
= control target key end

     0   :  { %s4030_s0 = inlined_call_operand.hbm [shape: bf16[2,512,512], index: 0, kind: input, shape index: {}]   ;;  %s4031_s1 = inlined_call_operand.hbm [shape: bf16[512,128], index: 1, kind: input, shape index: {}]   ;;  %s4032_s2 = inlined_call_operand.hbm [shape: f32[2,8,512], index: 2, kind: output, shape index: {}]  }
   0x1   :  { %4063 = sst [smem:[#allocation38_spill]] %s4030_s0 }
   0x2   :  { %4064 = sst [smem:[#allocation39_spill]] %s4032_s2 }
   0x3   :  { %7 = vsyncpa [#allocation4], 0 }
   0x4   :  { %9 = vsyncpa [#allocation4 + $0x1], 0 }
   0x5   :  { %10 = vsyncpa [#allocation7], 0 }
   0x6   :  { %12 = vsyncpa [#allocation7 + $0x1], 0 }
   0x7   :  { %13 = vsyncpa [#allocation5], 0 }
   0x8   :  { %15 = vsyncpa [#allocation5 + $0x1], 0  ;;  %s2780_s9 = smov 0   ;;  %s2782_s10 = smov 0  }
   0x9   :  { %s2784_s11 = smov 0   ;;  %s2786_s12 = smov 0  }
   0xa   :  { %s2788_s13 = smov 0   ;;  %s2790_s14 = smov 0  }
   0xb   :  { %s2792_s15 = smov 0   ;;  %s2794_s16 = smov 0  }
   0xc   :  { %s2796_s17 = smov 0   ;;  %s2798_s18 = smov 0  }
   0xd   :  { %s2800_s19 = smov 0   ;;  %s2802_s20 = smov 0  }
   0xe   :  { %s2804_s21 = smov 0   ;;  %s2806_s22 = smov 0  }
   0xf LB: > { %4065 = sst [smem:[#allocation12_spill]] %s2737_s18  ;;  %s33_s23 = sadd.s32 1, %s2745_s20  ;;  %s2753_s22 = sphi %s2806_s22, %s21_s22   ;;  %s2749_s21 = sphi %s2804_s21, %s4150_s21   ;;  %s2745_s20 = sphi %s2802_s20, %s4149_s20   ;;  %s2741_s19 = sphi %s2800_s19, %s4148_s19   ;;  %s2737_s18 = sphi %s2798_s18, %s4147_s18   ;;  %s2733_s17 = sphi %s2796_s17, %s4146_s17   ;;  %s2729_s16 = sphi %s2794_s16, %s4145_s16   ;;  %s2725_s15 = sphi %s2792_s15, %s4144_s15   ;;  %s2721_s14 = sphi %s2790_s14, %s4143_s14   ;;  %s2717_s13 = sphi %s2788_s13, %s4142_s13   ;;  %s2713_s12 = sphi %s2786_s12, %s4141_s12   ;;  %s2709_s11 = sphi %s2784_s11, %s4140_s11   ;;  %s2705_s10 = sphi %s2782_s10, %s4139_s10   ;;  %s2701_s9 = sphi %s2780_s9, %s4138_s9  }
  0x10   : > { %4066 = sst [smem:[#allocation13_spill]] %s2741_s19  ;;  %s40_s24 = sadd.s32 1, %s2749_s21 }
  0x11   : > { %p34_p0 = scmp.ge.s32.totalorder %s33_s23, 2  ;;  %s49_s25 = sadd.s32 1, %s2733_s17 }
  0x12   : > { %p56_p1 = scmp.ne.s32.totalorder %s2733_s17, %s2729_s16  ;;  %p4037_p2 = scmp.eq.s32.totalorder %s2753_s22, 0 }
  0x13   : > { %s4152_s23 = smov (%p34_p0, %s33_s23), 0  ;;  %s4154_s24 = smov (!%p34_p0, %s40_s24), %s2749_s21 }
  0x14   : > { %4067 = sst [smem:[#allocation14_spill]] %s4152_s23  ;;  %s2861_s26 = ssub.s32 %s2745_s20, %s4152_s23 }
  0x15   : > { %p2865_p3 = por %p4037_p2, %p56_p1  ;;  %p42_p4 = scmp.ge.s32.totalorder %s4154_s24, 2 }
  0x16   : > { %s105_s28 = sadd.s32 1, %s2709_s11  ;;  %p4036_p6 = scmp.lt.s32.totalorder %s2753_s22, 4 }
  0x17   : > { %s4156_s24 = smov (%p42_p4, %s4154_s24), 0  ;;  %s142_s29 = sand.u32 1, %s2733_s17  }
  0x18   : > { %4069 = sst [smem:[#allocation15_spill]] %s4156_s24  ;;  %s44_s30 = ssub.s32 %s2749_s21, %s4156_s24 }
  0x19   : > { %s46_s3 = sor.u32 %s2861_s26, %s44_s30  ;;  %p103_p7 = scmp.eq.s32.totalorder %s44_s30, 0 }
  0x1a   : > { %p47_p8 = scmp.eq.s32.totalorder %s46_s3, 0  ;;  %s2159_s4 = sshll.u32 %s142_s29, 9 }
  0x1b   : > { %s2880_s5 = scalar_select %p103_p7, %s2709_s11, %s105_s28  }
  0x1c   : > { %s2883_s6 = scalar_select %p47_p8, %s2733_s17, %s49_s25  }
  0x1d   : > { %s2160_s7 = sshll.u32 %s2745_s20, 1  ;;  %s2161_s8 = sshll.u32 %s2749_s21, 8 }
  0x1e   : > { %s146_s23 = scalar_lea.vmem [#allocation3], %s2159_s4  ;;  %s152_s19 = sadd.s32 %s2161_s8, %s2160_s7 }
  0x1f   : > { %s155_s2 = sshll.u32 %s146_s23, 4  ;;  %s2162_s18 = sshll.u32 %s152_s19, 6  ;;  %s2887_s2 = int_to_ptr.vmem [resolvable:$true] %s155_s2 }
  0x20   : > { %p2893_p9 = pnand %p4036_p6, %p2865_p3  ;;  %s4071_s0 = sld [smem:[#allocation38_spill]] }
  0x21   : > { %p2166_p10 = scmp.ge.s32.totalorder %s2753_s22, 1  ;;  %s2903_s23 = scalar_lea.sflag [#allocation4], %s142_s29 }
  0x22   : > { %p2545_p12 = pneg %p2893_p9 }
  0x26   : > { %s2900_s25 = scalar_lea.hbm %s4071_s0, %s2162_s18  ;;  %s2548_s18 = scalar_lea.hbm %s4071_s0, 32768 }
  0x27   : > { %s2543_s19 = scalar_lea.hbm %s2900_s25, 8192  ;;  %p2549_p1 = scmp.lt.u32.totalorder %s2900_s25, %s4071_s0 }
  0x28   : > { %p2544_p11 = scmp.ne.s32.totalorder %s2900_s25, %s2543_s19  ;;  %p2550_p3 = scmp.lt.u32.totalorder %s2548_s18, %s2543_s19 }
  0x29   : > { %p2552_p7 = scmp.lt.u32.totalorder %s2543_s19, %s2900_s25 }
  0x2a   : > { %p2546_p13 = pnand %p2545_p12, %p2544_p11  ;;  %p2551_p4 = por %p2550_p3, %p2549_p1 }
  0x2c   : > { %p2547_p0 = pneg %p2546_p13  ;;  %p2553_p8 = por %p2552_p7, %p2551_p4 }
  0x2e   : > { %p2554_p6 = pnand %p2553_p8, %p2547_p0 }
  0x30   : > { %2557 = shalt.err (!%p2554_p6)
}
  0x31   : > { %s2558_s29 = scalar_lea.vmem %s2887_s2, 8192  ;;  %s2755_s8 = smov [#allocation3]  }
  0x32   : > { %p2559_p11 = scmp.ne.s32.totalorder %s2887_s2, %s2558_s29  ;;  %s2563_s30 = sshll.u32 %s2755_s8, 4  ;;  %s2564_s30 = int_to_ptr.vmem [resolvable:$false] %s2563_s30 }
  0x33   : > { %s2565_s3 = scalar_lea.vmem %s2564_s30, 16384  ;;  %p2566_p5 = scmp.lt.s32.totalorder %s2887_s2, %s2564_s30 }
  0x34   : > { %p2561_p13 = pnand %p2559_p11, %p2545_p12  ;;  %p2567_p1 = scmp.lt.s32.totalorder %s2565_s3, %s2558_s29 }
  0x36   : > { %p2562_p2 = pneg %p2561_p13  ;;  %p2568_p3 = por %p2567_p1, %p2566_p5 }
  0x38   : > { %p2569_p4 = pnand %p2568_p3, %p2562_p2 }
  0x3a   : > { %2572 = shalt.err (!%p2569_p4)
}
  0x3b   : > { %s2756_s19 = smov 256   ;;  %s2757_s27 = smov 128  }
  0x3c   : > { %s2758_s28 = smov 8   ;;  %p185_p2 = scmp.lt.s32.totalorder %s2753_s22, 5 }
  0x3d   : > { %2300 = dma.hbm_to_vmem [thread:$0]  (!%p2893_p9), %s2900_s25, 8192, %s2887_s2, %s2903_s23, %s2756_s19, %s2757_s27, %s2758_s28  }
  0x3e   : > { %p2934_p5 = pnand %p2166_p10, %p185_p2  ;;  %s2155_s4 = sadd.s32 4294967295, %s2753_s22  }
  0x3f   : > { %s2156_s7 = sadd.s32 4294967294, %s2753_s22   ;;  %p63_p6 = scmp.eq.s32.totalorder %s2155_s4, 0 }
  0x40   : > { %p75_p12 = scmp.eq.s32.totalorder %s2861_s26, 0  ;;  %s77_s29 = sadd.s32 1, %s2721_s14 }
  0x41   : > { %p84_p0 = scmp.ne.s32.totalorder %s2721_s14, %s2717_s13  ;;  %p4073_p7 = scmp.ne.s32.totalorder %s2729_s16, %s2725_s15 }
  0x42   : > { %p90_p9 = scmp.ne.s32.totalorder %s2717_s13, %s2713_s12  ;;  %p4075_p10 = scmp.eq.s32.totalorder %s2753_s22, 0 }
  0x43   : > { %p2947_p8 = por %p63_p6, %p4073_p7  ;;  %p115_p1 = scmp.ne.s32.totalorder %s2709_s11, %s2705_s10 }
  0x44   : > { %s2954_s2 = scalar_select %p75_p12, %s2721_s14, %s77_s29  }
  0x45   : > { %s4074_s24 = scalar_select %p2947_p8, 1, 0 }
  0x46   : > { %p2958_p11 = por %p84_p0, %p4075_p10  ;;  %p2962_p13 = por %p90_p9, %p63_p6 }
  0x47   : > { %p116_p3 = scmp.eq.s32.totalorder %s2155_s4, 3  ;;  %p121_p4 = scmp.ne.s32.totalorder %s2705_s10, %s2701_s9 }
  0x48   : > { %s4077_s26 = scalar_select %p2962_p13, 1, 0 }
  0x49   : > { %p122_p2 = scmp.eq.s32.totalorder %s2156_s7, 3  ;;  %p2970_p7 = por %p116_p3, %p115_p1 }
  0x4a   : > { %s165_s12 = sand.u32 1, %s2721_s14   ;;  %s2257_s30 = sshll.u32 %s2745_s20, 11 }
  0x4b   : > { %s4078_s15 = scalar_select %p2970_p7, 1, 0 }
  0x4c   : > { %p2975_p12 = por %p122_p2, %p121_p4  ;;  %s2163_s8 = sshll.u32 %s165_s12, 7 }
  0x4d   : > { %s2983_s27 = scalar_lea.hbm %s4031_s1, %s2257_s30  ;;  %s169_s28 = scalar_lea.vmem [#allocation6], %s2163_s8 }
  0x4e   : > { %s4079_s23 = scalar_select %p2975_p12, 1, 0 }
  0x4f   : > { %s177_s4 = sshll.u32 %s169_s28, 4  ;;  %p4080_p6 = scmp.lt.s32.totalorder %s2753_s22, 4  ;;  %s2993_s4 = int_to_ptr.vmem [resolvable:$true] %s177_s4 }
  0x50   : > { %s2995_s29 = scalar_lea.sflag [#allocation7], %s165_s12  ;;  %s2573_s30 = scalar_lea.hbm %s2983_s27, 2048 }
  0x51   : > { %p2989_p0 = pnand %p4080_p6, %p2958_p11  ;;  %p2574_p9 = scmp.ne.s32.totalorder %s2983_s27, %s2573_s30 }
  0x52   : > { %s2578_s3 = scalar_lea.hbm %s4031_s1, 4096  ;;  %p2579_p11 = scmp.lt.u32.totalorder %s2983_s27, %s4031_s1 }
  0x53   : > { %p2575_p10 = pneg %p2989_p0  ;;  %p2580_p4 = scmp.lt.u32.totalorder %s2578_s3, %s2573_s30 }
  0x54   : > { %p2582_p6 = scmp.lt.u32.totalorder %s2573_s30, %s2983_s27 }
  0x55   : > { %p2576_p1 = pnand %p2575_p10, %p2574_p9  ;;  %p2581_p2 = por %p2580_p4, %p2579_p11 }
  0x57   : > { %p2577_p3 = pneg %p2576_p1  ;;  %p2583_p12 = por %p2582_p6, %p2581_p2 }
  0x59   : > { %p2584_p7 = pnand %p2583_p12, %p2577_p3 }
  0x5b   : > { %2587 = shalt.err (!%p2584_p7)
}
  0x5c   : > { %s2588_s12 = scalar_lea.vmem %s2993_s4, 2048  ;;  %s2759_s25 = smov [#allocation6]  }
  0x5d   : > { %p2589_p9 = scmp.ne.s32.totalorder %s2993_s4, %s2588_s12  ;;  %s2593_s8 = sshll.u32 %s2759_s25, 4  ;;  %s2594_s8 = int_to_ptr.vmem [resolvable:$false] %s2593_s8 }
  0x5e   : > { %s2595_s19 = scalar_lea.vmem %s2594_s8, 4096  ;;  %p2596_p8 = scmp.lt.s32.totalorder %s2993_s4, %s2594_s8 }
  0x5f   : > { %p2591_p1 = pnand %p2589_p9, %p2575_p10  ;;  %p2597_p11 = scmp.lt.s32.totalorder %s2595_s19, %s2588_s12 }
  0x61   : > { %p2592_p13 = pneg %p2591_p1  ;;  %p2598_p4 = por %p2597_p11, %p2596_p8 }
  0x63   : > { %p2599_p2 = pnand %p2598_p4, %p2592_p13 }
  0x65   : > { %2602 = shalt.err (!%p2599_p2)
}
  0x66   : > { %s2760_s30 = smov 64   ;;  %s2761_s3 = smov 4  }
  0x67   : > { %2303 = dma.hbm_to_vmem [thread:$0]  (!%p2989_p0), %s2983_s27, 2048, %s2993_s4, %s2995_s29, %s2760_s30, %s2760_s30, %s2761_s3  }
  0x68   : > { %189 = sbr.rel (%p2934_p5) target bundleno = 944 (0x3b0), region = 28  ;;  %s191_s28 = sand.u32 (!%p2934_p5), 1, %s2729_s16  }
  0x69   : > { %s2167_s25 = sshll.u32 (!%p2934_p5), %s191_s28, 9  ;;  %s192_s8 = scalar_lea.sflag (!%p2934_p5), [#allocation4], %s191_s28 }
  0x6a   : > { %s3026_s12 = scalar_lea.vmem (!%p2934_p5), [#allocation3], %s2167_s25  ;;  %p4082_p8 = scmp.ne.s32.totalorder (!%p2934_p5), %s4074_s24, 0 }
  0x6f   : > { %2688 = dma.done.wait (%p4082_p8), %s192_s8, 8192  }
  0x70   : > { %2690 = vsyncadd (%p4082_p8), %s192_s8, 4294959104  ;;  %s200_s19 = sand.u32 1, %s2717_s13   ;;  %p4083_p5 = scmp.ne.s32.totalorder %s4077_s26, 0 }
  0x71   : > { %s2168_s7 = sshll.u32 %s200_s19, 7  ;;  %s201_s27 = scalar_lea.sflag [#allocation7], %s200_s19 }
  0x72   : > { %s3033_s4 = scalar_lea.vmem [#allocation6], %s2168_s7 }
  0x73   : > { %2692 = dma.done.wait (%p4083_p5), %s201_s27, 2048  }
  0x74   : > { %2694 = vsyncadd (%p4083_p5), %s201_s27, 4294965248  ;;  %s227_s18 = sand.u32 1, %s2705_s10   ;;  %s4084_s24 = sld [smem:[#allocation12_spill]] }
  0x75   : > { %s2169_s29 = sshll.u32 %s227_s18, 5 }
  0x76   : > { %s3042_s30 = scalar_lea.vmem [#allocation8], %s2169_s29 }
  0x7a   : > { %p2170_p13 = scmp.ne.s32.totalorder %s4084_s24, 0 }
  0x7b   : > { %v2762_v0 = vmov (!%p2170_p13), 0.0  }
  0x7c   : > { %236 = sbr.rel (%p2170_p13) target bundleno = 156 (0x9c), region = 40  ;;  %237 = vst [vmem:[#allocation2] sm:$0xff] (!%p2170_p13), %v2762_v0  ;;  %238 = vst [vmem:[#allocation2 + $0x8] sm:$0xff] (!%p2170_p13), %v2762_v0 }
  0x7d   : > { %239 = vst [vmem:[#allocation2 + $0x10] sm:$0xff] (!%p2170_p13), %v2762_v0  ;;  %240 = vst [vmem:[#allocation2 + $0x18] sm:$0xff] (!%p2170_p13), %v2762_v0 }
  0x7e   : > { %241 = vst [vmem:[#allocation2 + $0x20] sm:$0xff] (!%p2170_p13), %v2762_v0  ;;  %242 = vst [vmem:[#allocation2 + $0x28] sm:$0xff] (!%p2170_p13), %v2762_v0 }
  0x7f   : > { %243 = vst [vmem:[#allocation2 + $0x30] sm:$0xff] (!%p2170_p13), %v2762_v0  ;;  %244 = vst [vmem:[#allocation2 + $0x38] sm:$0xff] (!%p2170_p13), %v2762_v0 }
  0x80   : > { %245 = vst [vmem:[#allocation2 + $0x40] sm:$0xff] (!%p2170_p13), %v2762_v0  ;;  %246 = vst [vmem:[#allocation2 + $0x48] sm:$0xff] (!%p2170_p13), %v2762_v0 }
  0x81   : > { %247 = vst [vmem:[#allocation2 + $0x50] sm:$0xff] (!%p2170_p13), %v2762_v0  ;;  %248 = vst [vmem:[#allocation2 + $0x58] sm:$0xff] (!%p2170_p13), %v2762_v0 }
  0x82   : > { %249 = vst [vmem:[#allocation2 + $0x60] sm:$0xff] (!%p2170_p13), %v2762_v0  ;;  %250 = vst [vmem:[#allocation2 + $0x68] sm:$0xff] (!%p2170_p13), %v2762_v0 }
  0x83   : > { %251 = vst [vmem:[#allocation2 + $0x70] sm:$0xff] %v2762_v0  ;;  %252 = vst [vmem:[#allocation2 + $0x78] sm:$0xff] %v2762_v0 }
  0x84   : > { %253 = vst [vmem:[#allocation2 + $0x80] sm:$0xff] %v2762_v0  ;;  %254 = vst [vmem:[#allocation2 + $0x88] sm:$0xff] %v2762_v0 }
  0x85   : > { %255 = vst [vmem:[#allocation2 + $0x90] sm:$0xff] %v2762_v0  ;;  %256 = vst [vmem:[#allocation2 + $0x98] sm:$0xff] %v2762_v0 }
  0x86   : > { %257 = vst [vmem:[#allocation2 + $0xa0] sm:$0xff] %v2762_v0  ;;  %258 = vst [vmem:[#allocation2 + $0xa8] sm:$0xff] %v2762_v0 }
  0x87   : > { %259 = vst [vmem:[#allocation2 + $0xb0] sm:$0xff] %v2762_v0  ;;  %260 = vst [vmem:[#allocation2 + $0xb8] sm:$0xff] %v2762_v0 }
  0x88   : > { %261 = vst [vmem:[#allocation2 + $0xc0] sm:$0xff] %v2762_v0  ;;  %262 = vst [vmem:[#allocation2 + $0xc8] sm:$0xff] %v2762_v0 }
  0x89   : > { %263 = vst [vmem:[#allocation2 + $0xd0] sm:$0xff] %v2762_v0  ;;  %264 = vst [vmem:[#allocation2 + $0xd8] sm:$0xff] %v2762_v0 }
  0x8a   : > { %265 = vst [vmem:[#allocation2 + $0xe0] sm:$0xff] %v2762_v0  ;;  %266 = vst [vmem:[#allocation2 + $0xe8] sm:$0xff] %v2762_v0 }
  0x8b   : > { %267 = vst [vmem:[#allocation2 + $0xf0] sm:$0xff] %v2762_v0  ;;  %268 = vst [vmem:[#allocation2 + $0xf8] sm:$0xff] %v2762_v0 }
  0x8c   : > { %269 = vst [vmem:[#allocation2 + $0x100] sm:$0xff] %v2762_v0  ;;  %270 = vst [vmem:[#allocation2 + $0x108] sm:$0xff] %v2762_v0 }
  0x8d   : > { %271 = vst [vmem:[#allocation2 + $0x110] sm:$0xff] %v2762_v0  ;;  %272 = vst [vmem:[#allocation2 + $0x118] sm:$0xff] %v2762_v0 }
  0x8e   : > { %273 = vst [vmem:[#allocation2 + $0x120] sm:$0xff] %v2762_v0  ;;  %274 = vst [vmem:[#allocation2 + $0x128] sm:$0xff] %v2762_v0 }
  0x8f   : > { %275 = vst [vmem:[#allocation2 + $0x130] sm:$0xff] %v2762_v0  ;;  %276 = vst [vmem:[#allocation2 + $0x138] sm:$0xff] %v2762_v0 }
  0x90   : > { %277 = vst [vmem:[#allocation2 + $0x140] sm:$0xff] %v2762_v0  ;;  %278 = vst [vmem:[#allocation2 + $0x148] sm:$0xff] %v2762_v0 }
  0x91   : > { %279 = vst [vmem:[#allocation2 + $0x150] sm:$0xff] %v2762_v0  ;;  %280 = vst [vmem:[#allocation2 + $0x158] sm:$0xff] %v2762_v0 }
  0x92   : > { %281 = vst [vmem:[#allocation2 + $0x160] sm:$0xff] %v2762_v0  ;;  %282 = vst [vmem:[#allocation2 + $0x168] sm:$0xff] %v2762_v0 }
  0x93   : > { %283 = vst [vmem:[#allocation2 + $0x170] sm:$0xff] %v2762_v0  ;;  %284 = vst [vmem:[#allocation2 + $0x178] sm:$0xff] %v2762_v0 }
  0x94   : > { %285 = vst [vmem:[#allocation2 + $0x180] sm:$0xff] %v2762_v0  ;;  %286 = vst [vmem:[#allocation2 + $0x188] sm:$0xff] %v2762_v0 }
  0x95   : > { %287 = vst [vmem:[#allocation2 + $0x190] sm:$0xff] %v2762_v0  ;;  %288 = vst [vmem:[#allocation2 + $0x198] sm:$0xff] %v2762_v0 }
  0x96   : > { %289 = vst [vmem:[#allocation2 + $0x1a0] sm:$0xff] %v2762_v0  ;;  %290 = vst [vmem:[#allocation2 + $0x1a8] sm:$0xff] %v2762_v0 }
  0x97   : > { %291 = vst [vmem:[#allocation2 + $0x1b0] sm:$0xff] %v2762_v0  ;;  %292 = vst [vmem:[#allocation2 + $0x1b8] sm:$0xff] %v2762_v0 }
  0x98   : > { %293 = vst [vmem:[#allocation2 + $0x1c0] sm:$0xff] %v2762_v0  ;;  %294 = vst [vmem:[#allocation2 + $0x1c8] sm:$0xff] %v2762_v0 }
  0x99   : > { %295 = vst [vmem:[#allocation2 + $0x1d0] sm:$0xff] %v2762_v0  ;;  %296 = vst [vmem:[#allocation2 + $0x1d8] sm:$0xff] %v2762_v0 }
  0x9a   : > { %297 = vst [vmem:[#allocation2 + $0x1e0] sm:$0xff] %v2762_v0  ;;  %298 = vst [vmem:[#allocation2 + $0x1e8] sm:$0xff] %v2762_v0 }
  0x9b   : > { %299 = vst [vmem:[#allocation2 + $0x1f0] sm:$0xff] %v2762_v0  ;;  %300 = vst [vmem:[#allocation2 + $0x1f8] sm:$0xff] %v2762_v0 }
  0x9c PF: > { %v2429_v1 = vld [vmem:[%s3033_s4] sm:$0xff]   ;;  %v2763_v2 = vmov 0   ;;  %v2430_v3 = vld [vmem:[%s3033_s4 + $0x8] sm:$0xff]   ;;  %v2431_v4 = vld [vmem:[%s3033_s4 + $0x10] sm:$0xff]   ;;  %s4085_s26 = sld [smem:[#allocation12_spill]] }
  0x9d   : > { %877 = vmatprep.subr.bf16.mxu0 %v2763_v2  ;;  %2259 = vmatprep.subr.bf16.mxu1 %v2763_v2  ;;  %v2432_v5 = vld [vmem:[%s3033_s4 + $0x18] sm:$0xff]   ;;  %v2433_v6 = vld [vmem:[%s3033_s4 + $0x20] sm:$0xff]   ;;  %v2434_v8 = vld [vmem:[%s3033_s4 + $0x28] sm:$0xff]  }
  0x9e   : > { %878 = vmatpush1.bf16.msra.mxu0 %v2429_v1  ;;  %2275 = vmatpush1.bf16.msra.mxu1 %v2429_v1  ;;  %v2447_v7 = vld [vmem:[%s3026_s12 + $0x4] ss:$8 sps:$4 sm:$0xff]   ;;  %v2435_v10 = vld [vmem:[%s3033_s4 + $0x30] sm:$0xff]   ;;  %v2436_v11 = vld [vmem:[%s3033_s4 + $0x38] sm:$0xff]  }
  0x9f   : > { %879 = vmatprep.subr.bf16.mxu0 %v2763_v2  ;;  %2260 = vmatprep.subr.bf16.mxu1 %v2763_v2  ;;  %v2450_v9 = vld [vmem:[%s3026_s12 + $0x104] ss:$8 sps:$4 sm:$0xff]   ;;  %v2439_v14 = vld [vmem:[%s3033_s4 + $0x50] sm:$0xff]   ;;  %v2440_v15 = vld [vmem:[%s3033_s4 + $0x58] sm:$0xff]  }
  0xa0   : > { %909 = vmatprep.mubr.bf16.mxu0 %v2447_v7  ;;  %1037 = vmatprep.mubr.bf16.mxu1 %v2450_v9  ;;  %v2437_v12 = vld [vmem:[%s3033_s4 + $0x40] sm:$0xff]   ;;  %v2438_v13 = vld [vmem:[%s3033_s4 + $0x48] sm:$0xff]   ;;  %v2443_v18 = vld [vmem:[%s3033_s4 + $0x70] sm:$0xff]  }
  0xa1   : > { %v2441_v16 = vld [vmem:[%s3033_s4 + $0x60] sm:$0xff]   ;;  %v2442_v17 = vld [vmem:[%s3033_s4 + $0x68] sm:$0xff]   ;;  %v2444_v19 = vld [vmem:[%s3033_s4 + $0x78] sm:$0xff]  }
  0xa2   : > { %880 = vmatpush1.bf16.msra.mxu0 %v2430_v3  ;;  %2276 = vmatpush1.bf16.msra.mxu1 %v2430_v3  ;;  %v2445_v20 = vld [vmem:[%s3026_s12] ss:$8 sps:$4 sm:$0xff]   ;;  %v2451_v22 = vld [vmem:[%s3026_s12 + $0x14] ss:$8 sps:$4 sm:$0xff]   ;;  %v2455_v24 = vld [vmem:[%s3026_s12 + $0x10] ss:$8 sps:$4 sm:$0xff]  }
  0xa3   : > { %881 = vmatprep.subr.bf16.mxu0 %v2763_v2  ;;  %2261 = vmatprep.subr.bf16.mxu1 %v2763_v2  ;;  %v2448_v21 = vld [vmem:[%s3026_s12 + $0x100] ss:$8 sps:$4 sm:$0xff]   ;;  %v2453_v23 = vld [vmem:[%s3026_s12 + $0x114] ss:$8 sps:$4 sm:$0xff]   ;;  %v2456_v25 = vld [vmem:[%s3026_s12 + $0x110] ss:$8 sps:$4 sm:$0xff]  }
  0xa4   : > { %v2457_v26 = vld [vmem:[%s3026_s12 + $0x24] ss:$8 sps:$4 sm:$0xff]   ;;  %v2461_v28 = vld [vmem:[%s3026_s12 + $0x20] ss:$8 sps:$4 sm:$0xff]   ;;  %v2463_v30 = vld [vmem:[%s3026_s12 + $0x34] ss:$8 sps:$4 sm:$0xff]  }
  0xa5   : > { %v2459_v27 = vld [vmem:[%s3026_s12 + $0x124] ss:$8 sps:$4 sm:$0xff]   ;;  %v2462_v29 = vld [vmem:[%s3026_s12 + $0x120] ss:$8 sps:$4 sm:$0xff]   ;;  %v2465_v31 = vld [vmem:[%s3026_s12 + $0x134] ss:$8 sps:$4 sm:$0xff]  }
  0xa6   : > { %882 = vmatpush1.bf16.msra.mxu0 %v2431_v4  ;;  %2277 = vmatpush1.bf16.msra.mxu1 %v2431_v4  ;;  %v2467_v32 = vld [vmem:[%s3026_s12 + $0x30] ss:$8 sps:$4 sm:$0xff]   ;;  %v2469_v34 = vld [vmem:[%s3026_s12 + $0x44] ss:$8 sps:$4 sm:$0xff]   ;;  %v2473_v36 = vld [vmem:[%s3026_s12 + $0x40] ss:$8 sps:$4 sm:$0xff]  }
  0xa7   : > { %883 = vmatprep.subr.bf16.mxu0 %v2763_v2  ;;  %2262 = vmatprep.subr.bf16.mxu1 %v2763_v2  ;;  %v2468_v33 = vld [vmem:[%s3026_s12 + $0x130] ss:$8 sps:$4 sm:$0xff]   ;;  %v2471_v35 = vld [vmem:[%s3026_s12 + $0x144] ss:$8 sps:$4 sm:$0xff]   ;;  %v2474_v37 = vld [vmem:[%s3026_s12 + $0x140] ss:$8 sps:$4 sm:$0xff]  }
  0xa8   : > { %v2475_v38 = vld [vmem:[%s3026_s12 + $0x54] ss:$8 sps:$4 sm:$0xff]   ;;  %v2479_v40 = vld [vmem:[%s3026_s12 + $0x50] ss:$8 sps:$4 sm:$0xff]   ;;  %v2481_v42 = vld [vmem:[%s3026_s12 + $0x64] ss:$8 sps:$4 sm:$0xff]  }
  0xa9   : > { %v2477_v39 = vld [vmem:[%s3026_s12 + $0x154] ss:$8 sps:$4 sm:$0xff]   ;;  %v2480_v41 = vld [vmem:[%s3026_s12 + $0x150] ss:$8 sps:$4 sm:$0xff]   ;;  %v2483_v43 = vld [vmem:[%s3026_s12 + $0x164] ss:$8 sps:$4 sm:$0xff]  }
  0xaa   : > { %884 = vmatpush1.bf16.msra.mxu0 %v2432_v5  ;;  %2278 = vmatpush1.bf16.msra.mxu1 %v2432_v5  ;;  %v2485_v44 = vld [vmem:[%s3026_s12 + $0x60] ss:$8 sps:$4 sm:$0xff]   ;;  %v2487_v46 = vld [vmem:[%s3026_s12 + $0x74] ss:$8 sps:$4 sm:$0xff]   ;;  %v2491_v48 = vld [vmem:[%s3026_s12 + $0x70] ss:$8 sps:$4 sm:$0xff]  }
  0xab   : > { %885 = vmatprep.subr.bf16.mxu0 %v2763_v2  ;;  %2263 = vmatprep.subr.bf16.mxu1 %v2763_v2  ;;  %v2486_v45 = vld [vmem:[%s3026_s12 + $0x160] ss:$8 sps:$4 sm:$0xff]   ;;  %v2489_v47 = vld [vmem:[%s3026_s12 + $0x174] ss:$8 sps:$4 sm:$0xff]   ;;  %v2492_v49 = vld [vmem:[%s3026_s12 + $0x170] ss:$8 sps:$4 sm:$0xff]  }
  0xac   : > { %v2493_v50 = vld [vmem:[%s3026_s12 + $0x84] ss:$8 sps:$4 sm:$0xff]   ;;  %v2497_v52 = vld [vmem:[%s3026_s12 + $0x80] ss:$8 sps:$4 sm:$0xff]   ;;  %v2499_v54 = vld [vmem:[%s3026_s12 + $0x94] ss:$8 sps:$4 sm:$0xff]  }
  0xad   : > { %v2495_v51 = vld [vmem:[%s3026_s12 + $0x184] ss:$8 sps:$4 sm:$0xff]   ;;  %v2498_v53 = vld [vmem:[%s3026_s12 + $0x180] ss:$8 sps:$4 sm:$0xff]   ;;  %v2501_v55 = vld [vmem:[%s3026_s12 + $0x194] ss:$8 sps:$4 sm:$0xff]  }
  0xae   : > { %886 = vmatpush1.bf16.msra.mxu0 %v2433_v6  ;;  %2279 = vmatpush1.bf16.msra.mxu1 %v2433_v6  ;;  %v2503_v56 = vld [vmem:[%s3026_s12 + $0x90] ss:$8 sps:$4 sm:$0xff]   ;;  %v2505_v58 = vld [vmem:[%s3026_s12 + $0xa4] ss:$8 sps:$4 sm:$0xff]   ;;  %v2509_v60 = vld [vmem:[%s3026_s12 + $0xa0] ss:$8 sps:$4 sm:$0xff]  }
  0xaf   : > { %887 = vmatprep.subr.bf16.mxu0 %v2763_v2  ;;  %2264 = vmatprep.subr.bf16.mxu1 %v2763_v2  ;;  %v2504_v57 = vld [vmem:[%s3026_s12 + $0x190] ss:$8 sps:$4 sm:$0xff]   ;;  %v2507_v59 = vld [vmem:[%s3026_s12 + $0x1a4] ss:$8 sps:$4 sm:$0xff]   ;;  %v2510_v61 = vld [vmem:[%s3026_s12 + $0x1a0] ss:$8 sps:$4 sm:$0xff]  }
  0xb0   : > { %v2511_v62 = vld [vmem:[%s3026_s12 + $0xb4] ss:$8 sps:$4 sm:$0xff]   ;;  %v2515_v0 = vld [vmem:[%s3026_s12 + $0xb0] ss:$8 sps:$4 sm:$0xff]   ;;  %v2519_v3 = vld [vmem:[%s3026_s12 + $0x1c4] ss:$8 sps:$4 sm:$0xff]  }
  0xb1   : > { %v2513_v63 = vld [vmem:[%s3026_s12 + $0x1b4] ss:$8 sps:$4 sm:$0xff]   ;;  %v2516_v1 = vld [vmem:[%s3026_s12 + $0x1b0] ss:$8 sps:$4 sm:$0xff]   ;;  %v2521_v4 = vld [vmem:[%s3026_s12 + $0xc0] ss:$8 sps:$4 sm:$0xff]  }
  0xb2   : > { %888 = vmatpush1.bf16.msra.mxu0 %v2434_v8  ;;  %2280 = vmatpush1.bf16.msra.mxu1 %v2434_v8  ;;  %v2522_v5 = vld [vmem:[%s3026_s12 + $0x1c0] ss:$8 sps:$4 sm:$0xff]   ;;  %v2523_v6 = vld [vmem:[%s3026_s12 + $0xd4] ss:$8 sps:$4 sm:$0xff]   ;;  %v2527_v8 = vld [vmem:[%s3026_s12 + $0xd0] ss:$8 sps:$4 sm:$0xff]  }
  0xb3   : > { %889 = vmatprep.subr.bf16.mxu0 %v2763_v2  ;;  %2265 = vmatprep.subr.bf16.mxu1 %v2763_v2  ;;  %v2525_v7 = vld [vmem:[%s3026_s12 + $0x1d4] ss:$8 sps:$4 sm:$0xff]   ;;  %v2528_v9 = vld [vmem:[%s3026_s12 + $0x1d0] ss:$8 sps:$4 sm:$0xff]   ;;  %p2251_p7 = scmp.ne.s32.totalorder %s4085_s26, 1 }
  0xb6   : > { %890 = vmatpush1.bf16.msra.mxu0 %v2435_v10  ;;  %2281 = vmatpush1.bf16.msra.mxu1 %v2435_v10  ;;  %v2529_v10 = vld [vmem:[%s3026_s12 + $0xe4] ss:$8 sps:$4 sm:$0xff]  }
  0xb7   : > { %891 = vmatprep.subr.bf16.mxu0 %v2763_v2  ;;  %2266 = vmatprep.subr.bf16.mxu1 %v2763_v2 }
  0xba   : > { %892 = vmatpush1.bf16.msra.mxu0 %v2436_v11  ;;  %2282 = vmatpush1.bf16.msra.mxu1 %v2436_v11  ;;  %v2531_v11 = vld [vmem:[%s3026_s12 + $0x1e4] ss:$8 sps:$4 sm:$0xff]  }
  0xbb   : > { %893 = vmatprep.subr.bf16.mxu0 %v2763_v2  ;;  %2267 = vmatprep.subr.bf16.mxu1 %v2763_v2 }
  0xbe   : > { %894 = vmatpush1.bf16.msra.mxu0 %v2437_v12  ;;  %2283 = vmatpush1.bf16.msra.mxu1 %v2437_v12  ;;  %v2533_v12 = vld [vmem:[%s3026_s12 + $0xe0] ss:$8 sps:$4 sm:$0xff]  }
  0xbf   : > { %895 = vmatprep.subr.bf16.mxu0 %v2763_v2  ;;  %2268 = vmatprep.subr.bf16.mxu1 %v2763_v2 }
  0xc2   : > { %896 = vmatpush1.bf16.msra.mxu0 %v2438_v13  ;;  %2284 = vmatpush1.bf16.msra.mxu1 %v2438_v13  ;;  %v2534_v13 = vld [vmem:[%s3026_s12 + $0x1e0] ss:$8 sps:$4 sm:$0xff]  }
  0xc3   : > { %897 = vmatprep.subr.bf16.mxu0 %v2763_v2  ;;  %2269 = vmatprep.subr.bf16.mxu1 %v2763_v2 }
  0xc6   : > { %898 = vmatpush1.bf16.msra.mxu0 %v2439_v14  ;;  %2285 = vmatpush1.bf16.msra.mxu1 %v2439_v14  ;;  %v2535_v14 = vld [vmem:[%s3026_s12 + $0xf4] ss:$8 sps:$4 sm:$0xff]  }
  0xc7   : > { %899 = vmatprep.subr.bf16.mxu0 %v2763_v2  ;;  %2270 = vmatprep.subr.bf16.mxu1 %v2763_v2 }
  0xca   : > { %900 = vmatpush1.bf16.msra.mxu0 %v2440_v15  ;;  %2286 = vmatpush1.bf16.msra.mxu1 %v2440_v15  ;;  %v2537_v15 = vld [vmem:[%s3026_s12 + $0x1f4] ss:$8 sps:$4 sm:$0xff]  }
  0xcb   : > { %901 = vmatprep.subr.bf16.mxu0 %v2763_v2  ;;  %2271 = vmatprep.subr.bf16.mxu1 %v2763_v2 }
  0xce   : > { %902 = vmatpush1.bf16.msra.mxu0 %v2441_v16  ;;  %2287 = vmatpush1.bf16.msra.mxu1 %v2441_v16  ;;  %v2539_v16 = vld [vmem:[%s3026_s12 + $0xf0] ss:$8 sps:$4 sm:$0xff]  }
  0xcf   : > { %903 = vmatprep.subr.bf16.mxu0 %v2763_v2  ;;  %2272 = vmatprep.subr.bf16.mxu1 %v2763_v2 }
  0xd2   : > { %904 = vmatpush1.bf16.msra.mxu0 %v2442_v17  ;;  %2288 = vmatpush1.bf16.msra.mxu1 %v2442_v17  ;;  %v2540_v17 = vld [vmem:[%s3026_s12 + $0x1f0] ss:$8 sps:$4 sm:$0xff]  }
  0xd3   : > { %905 = vmatprep.subr.bf16.mxu0 %v2763_v2  ;;  %2273 = vmatprep.subr.bf16.mxu1 %v2763_v2 }
  0xd6   : > { %906 = vmatpush1.bf16.msra.mxu0 %v2443_v18  ;;  %2289 = vmatpush1.bf16.msra.mxu1 %v2443_v18  ;;  %v301_v18 = vld [vmem:[#allocation2] sm:$0xff] }
  0xd7   : > { %907 = vmatprep.subr.bf16.mxu0 %v2763_v2  ;;  %2274 = vmatprep.subr.bf16.mxu1 %v2763_v2  ;;  %v2517_v2 = vld [vmem:[%s3026_s12 + $0xc4] ss:$8 sps:$4 sm:$0xff]  }
  0xda   : > { %908 = vmatpush1.bf16.msra.mxu0 %v2444_v19  ;;  %2290 = vmatpush1.bf16.msra.mxu1 %v2444_v19  ;;  %v333_v19 = vld [vmem:[#allocation2 + $0x100] sm:$0xff] }
  0xdd   : > { %910 = vmatmul.mubr.bf16.vlgmr.msra.gmra.mrb[0].mxu0 %v2445_v20  ;;  %1038 = vmatmul.mubr.bf16.vlgmr.msra.gmra.mrb[0].mxu1 %v2448_v21 }
  0xde   : > { %917 = vmatprep.mubr.bf16.mxu0 %v2451_v22  ;;  %1045 = vmatprep.mubr.bf16.mxu1 %v2453_v23  ;;  %v302_v22 = vld [vmem:[#allocation2 + $0x8] sm:$0xff] }
  0xdf   : > { %v334_v23 = vld [vmem:[#allocation2 + $0x108] sm:$0xff] }
  0xe5   : > { %918 = vmatmul.mubr.bf16.gmra.mrb[4].mxu0 %v2455_v24  ;;  %1046 = vmatmul.mubr.bf16.gmra.mrb[4].mxu1 %v2456_v25 }
  0xe6   : > { %925 = vmatprep.mubr.bf16.mxu0 %v2457_v26  ;;  %1053 = vmatprep.mubr.bf16.mxu1 %v2459_v27 }
  0xed   : > { %926 = vmatmul.mubr.bf16.gmra.mrb[8].mxu0 %v2461_v28  ;;  %1054 = vmatmul.mubr.bf16.gmra.mrb[8].mxu1 %v2462_v29 }
  0xee   : > { %933 = vmatprep.mubr.bf16.mxu0 %v2463_v30  ;;  %1061 = vmatprep.mubr.bf16.mxu1 %v2465_v31 }
  0xf5   : > { %934 = vmatmul.mubr.bf16.gmra.mrb[12].mxu0 %v2467_v32  ;;  %1062 = vmatmul.mubr.bf16.gmra.mrb[12].mxu1 %v2468_v33 }
  0xf6   : > { %941 = vmatprep.mubr.bf16.mxu0 %v2469_v34  ;;  %1069 = vmatprep.mubr.bf16.mxu1 %v2471_v35  ;;  %v303_v34 = vld [vmem:[#allocation2 + $0x10] sm:$0xff] }
  0xf7   : > { %v335_v35 = vld [vmem:[#allocation2 + $0x110] sm:$0xff] }
  0xfd   : > { %942 = vmatmul.mubr.bf16.gmra.mrb[16].mxu0 %v2473_v36  ;;  %1070 = vmatmul.mubr.bf16.gmra.mrb[16].mxu1 %v2474_v37 }
  0xfe   : > { %949 = vmatprep.mubr.bf16.mxu0 %v2475_v38  ;;  %1077 = vmatprep.mubr.bf16.mxu1 %v2477_v39  ;;  %v304_v38 = vld [vmem:[#allocation2 + $0x18] sm:$0xff] }
  0xff   : > { %v336_v39 = vld [vmem:[#allocation2 + $0x118] sm:$0xff] }
 0x105   : > { %950 = vmatmul.mubr.bf16.gmra.mrb[20].mxu0 %v2479_v40  ;;  %1078 = vmatmul.mubr.bf16.gmra.mrb[20].mxu1 %v2480_v41 }
 0x106   : > { %957 = vmatprep.mubr.bf16.mxu0 %v2481_v42  ;;  %1085 = vmatprep.mubr.bf16.mxu1 %v2483_v43 }
 0x10d   : > { %958 = vmatmul.mubr.bf16.gmra.mrb[24].mxu0 %v2485_v44  ;;  %1086 = vmatmul.mubr.bf16.gmra.mrb[24].mxu1 %v2486_v45 }
 0x10e   : > { %965 = vmatprep.mubr.bf16.mxu0 %v2487_v46  ;;  %1093 = vmatprep.mubr.bf16.mxu1 %v2489_v47 }
 0x115   : > { %966 = vmatmul.mubr.bf16.gmra.mrb[28].mxu0 %v2491_v48  ;;  %1094 = vmatmul.mubr.bf16.gmra.mrb[28].mxu1 %v2492_v49 }
 0x116   : > { %973 = vmatprep.mubr.bf16.mxu0 %v2493_v50  ;;  %1101 = vmatprep.mubr.bf16.mxu1 %v2495_v51  ;;  %v305_v50 = vld [vmem:[#allocation2 + $0x20] sm:$0xff] }
 0x117   : > { %v337_v51 = vld [vmem:[#allocation2 + $0x120] sm:$0xff] }
 0x11d   : > { %974 = vmatmul.mubr.bf16.gmra.mrb[32].mxu0 %v2497_v52  ;;  %1102 = vmatmul.mubr.bf16.gmra.mrb[32].mxu1 %v2498_v53 }
 0x11e   : > { %981 = vmatprep.mubr.bf16.mxu0 %v2499_v54  ;;  %1109 = vmatprep.mubr.bf16.mxu1 %v2501_v55  ;;  %v306_v54 = vld [vmem:[#allocation2 + $0x28] sm:$0xff] }
 0x11f   : > { %v338_v55 = vld [vmem:[#allocation2 + $0x128] sm:$0xff] }
 0x125   : > { %982 = vmatmul.mubr.bf16.gmra.mrb[36].mxu0 %v2503_v56  ;;  %1110 = vmatmul.mubr.bf16.gmra.mrb[36].mxu1 %v2504_v57 }
 0x126   : > { %989 = vmatprep.mubr.bf16.mxu0 %v2505_v58  ;;  %1117 = vmatprep.mubr.bf16.mxu1 %v2507_v59 }
 0x12d   : > { %990 = vmatmul.mubr.bf16.gmra.mrb[40].mxu0 %v2509_v60  ;;  %1118 = vmatmul.mubr.bf16.gmra.mrb[40].mxu1 %v2510_v61 }
 0x12e   : > { %997 = vmatprep.mubr.bf16.mxu0 %v2511_v62  ;;  %1125 = vmatprep.mubr.bf16.mxu1 %v2513_v63 }
 0x135   : > { %998 = vmatmul.mubr.bf16.gmra.mrb[44].mxu0 %v2515_v0  ;;  %1126 = vmatmul.mubr.bf16.gmra.mrb[44].mxu1 %v2516_v1 }
 0x136   : > { %1005 = vmatprep.mubr.bf16.mxu0 %v2517_v2  ;;  %1133 = vmatprep.mubr.bf16.mxu1 %v2519_v3  ;;  %v307_v2 = vld [vmem:[#allocation2 + $0x30] sm:$0xff] }
 0x137   : > { %v339_v3 = vld [vmem:[#allocation2 + $0x130] sm:$0xff] }
 0x13d   : > { %1006 = vmatmul.mubr.bf16.gmra.mrb[48].mxu0 %v2521_v4  ;;  %1134 = vmatmul.mubr.bf16.gmra.mrb[48].mxu1 %v2522_v5 }
 0x13e   : > { %1013 = vmatprep.mubr.bf16.mxu0 %v2523_v6  ;;  %1141 = vmatprep.mubr.bf16.mxu1 %v2525_v7  ;;  %v308_v6 = vld [vmem:[#allocation2 + $0x38] sm:$0xff] }
 0x13f   : > { %v340_v7 = vld [vmem:[#allocation2 + $0x138] sm:$0xff] }
 0x145   : > { %1014 = vmatmul.mubr.bf16.gmra.mrb[52].mxu0 %v2527_v8  ;;  %1142 = vmatmul.mubr.bf16.gmra.mrb[52].mxu1 %v2528_v9 }
 0x146   : > { %1021 = vmatprep.mubr.bf16.mxu0 %v2529_v10  ;;  %1149 = vmatprep.mubr.bf16.mxu1 %v2531_v11 }
 0x14d   : > { %1022 = vmatmul.mubr.bf16.gmra.mrb[56].mxu0 %v2533_v12  ;;  %1150 = vmatmul.mubr.bf16.gmra.mrb[56].mxu1 %v2534_v13 }
 0x14e   : > { %1029 = vmatprep.mubr.bf16.mxu0 %v2535_v14  ;;  %1157 = vmatprep.mubr.bf16.mxu1 %v2537_v15 }
 0x155   : > { %1030 = vmatmul.mubr.bf16.gmra.mrb[60].mxu0 %v2539_v16  ;;  %1158 = vmatmul.mubr.bf16.gmra.mrb[60].mxu1 %v2540_v17 }
 0x1b0   : > { %v911_v20 = vpop.f32.mrb[0].mxu0  ;;  %v1039_v21 = vpop.f32.mrb[0].mxu1 }
 0x1b1   : > { %v1166_v24 = vadd.f32 %v911_v20, %v301_v18  ;;  %v1198_v25 = vadd.f32 %v1039_v21, %v333_v19  ;;  %v913_v26 = vpop.f32.mrb[1].mxu0  ;;  %v1041_v27 = vpop.f32.mrb[1].mxu1  ;;  %v309_v18 = vld [vmem:[#allocation2 + $0x40] sm:$0xff] }
 0x1b2   : > { %v914_v28 = vpop.f32.mrb[2].mxu0  ;;  %v1042_v29 = vpop.f32.mrb[2].mxu1  ;;  %v341_v19 = vld [vmem:[#allocation2 + $0x140] sm:$0xff] }
 0x1b3   : > { %1230 = vst [vmem:[#allocation2] sm:$0xff] %v1166_v24  ;;  %1262 = vst [vmem:[#allocation2 + $0x100] sm:$0xff] %v1198_v25  ;;  %v1167_v30 = vadd.f32 %v914_v28, %v302_v22  ;;  %v1199_v31 = vadd.f32 %v1042_v29, %v334_v23  ;;  %v916_v32 = vpop.f32.mrb[3].mxu0  ;;  %v1044_v33 = vpop.f32.mrb[3].mxu1  ;;  %v310_v22 = vld [vmem:[#allocation2 + $0x48] sm:$0xff] }
 0x1b4   : > { %v342_v23 = vld [vmem:[#allocation2 + $0x148] sm:$0xff] }
 0x1b5   : > { %1231 = vst [vmem:[#allocation2 + $0x8] sm:$0xff] %v1167_v30  ;;  %1263 = vst [vmem:[#allocation2 + $0x108] sm:$0xff] %v1199_v31 }
 0x1b8   : > { %v919_v36 = vpop.f32.mrb[4].mxu0  ;;  %v1047_v37 = vpop.f32.mrb[4].mxu1 }
 0x1b9   : > { %v1168_v40 = vadd.f32 %v919_v36, %v303_v34  ;;  %v1200_v41 = vadd.f32 %v1047_v37, %v335_v35  ;;  %v921_v42 = vpop.f32.mrb[5].mxu0  ;;  %v1049_v43 = vpop.f32.mrb[5].mxu1  ;;  %v311_v34 = vld [vmem:[#allocation2 + $0x50] sm:$0xff] }
 0x1ba   : > { %v922_v44 = vpop.f32.mrb[6].mxu0  ;;  %v1050_v45 = vpop.f32.mrb[6].mxu1  ;;  %v343_v35 = vld [vmem:[#allocation2 + $0x150] sm:$0xff] }
 0x1bb   : > { %1232 = vst [vmem:[#allocation2 + $0x10] sm:$0xff] %v1168_v40  ;;  %1264 = vst [vmem:[#allocation2 + $0x110] sm:$0xff] %v1200_v41  ;;  %v1169_v46 = vadd.f32 %v922_v44, %v304_v38  ;;  %v1201_v47 = vadd.f32 %v1050_v45, %v336_v39  ;;  %v924_v48 = vpop.f32.mrb[7].mxu0  ;;  %v1052_v49 = vpop.f32.mrb[7].mxu1  ;;  %v312_v38 = vld [vmem:[#allocation2 + $0x58] sm:$0xff] }
 0x1bc   : > { %v344_v39 = vld [vmem:[#allocation2 + $0x158] sm:$0xff] }
 0x1bd   : > { %1233 = vst [vmem:[#allocation2 + $0x18] sm:$0xff] %v1169_v46  ;;  %1265 = vst [vmem:[#allocation2 + $0x118] sm:$0xff] %v1201_v47 }
 0x1c0   : > { %v927_v52 = vpop.f32.mrb[8].mxu0  ;;  %v1055_v53 = vpop.f32.mrb[8].mxu1 }
 0x1c1   : > { %v1170_v56 = vadd.f32 %v927_v52, %v305_v50  ;;  %v1202_v57 = vadd.f32 %v1055_v53, %v337_v51  ;;  %v929_v58 = vpop.f32.mrb[9].mxu0  ;;  %v1057_v59 = vpop.f32.mrb[9].mxu1  ;;  %v313_v50 = vld [vmem:[#allocation2 + $0x60] sm:$0xff] }
 0x1c2   : > { %v930_v60 = vpop.f32.mrb[10].mxu0  ;;  %v1058_v61 = vpop.f32.mrb[10].mxu1  ;;  %v345_v51 = vld [vmem:[#allocation2 + $0x160] sm:$0xff] }
 0x1c3   : > { %1234 = vst [vmem:[#allocation2 + $0x20] sm:$0xff] %v1170_v56  ;;  %1266 = vst [vmem:[#allocation2 + $0x120] sm:$0xff] %v1202_v57  ;;  %v1171_v62 = vadd.f32 %v930_v60, %v306_v54  ;;  %v1203_v63 = vadd.f32 %v1058_v61, %v338_v55  ;;  %v932_v0 = vpop.f32.mrb[11].mxu0  ;;  %v1060_v1 = vpop.f32.mrb[11].mxu1  ;;  %v314_v54 = vld [vmem:[#allocation2 + $0x68] sm:$0xff] }
 0x1c4   : > { %v346_v55 = vld [vmem:[#allocation2 + $0x168] sm:$0xff] }
 0x1c5   : > { %1235 = vst [vmem:[#allocation2 + $0x28] sm:$0xff] %v1171_v62  ;;  %1267 = vst [vmem:[#allocation2 + $0x128] sm:$0xff] %v1203_v63 }
 0x1c8   : > { %v935_v4 = vpop.f32.mrb[12].mxu0  ;;  %v1063_v5 = vpop.f32.mrb[12].mxu1 }
 0x1c9   : > { %v1172_v8 = vadd.f32 %v935_v4, %v307_v2  ;;  %v1204_v9 = vadd.f32 %v1063_v5, %v339_v3  ;;  %v937_v10 = vpop.f32.mrb[13].mxu0  ;;  %v1065_v11 = vpop.f32.mrb[13].mxu1  ;;  %v315_v2 = vld [vmem:[#allocation2 + $0x70] sm:$0xff] }
 0x1ca   : > { %v938_v12 = vpop.f32.mrb[14].mxu0  ;;  %v1066_v13 = vpop.f32.mrb[14].mxu1  ;;  %v347_v3 = vld [vmem:[#allocation2 + $0x170] sm:$0xff] }
 0x1cb   : > { %1236 = vst [vmem:[#allocation2 + $0x30] sm:$0xff] %v1172_v8  ;;  %1268 = vst [vmem:[#allocation2 + $0x130] sm:$0xff] %v1204_v9  ;;  %v1173_v14 = vadd.f32 %v938_v12, %v308_v6  ;;  %v1205_v15 = vadd.f32 %v1066_v13, %v340_v7  ;;  %v940_v16 = vpop.f32.mrb[15].mxu0  ;;  %v1068_v17 = vpop.f32.mrb[15].mxu1  ;;  %v316_v6 = vld [vmem:[#allocation2 + $0x78] sm:$0xff] }
 0x1cc   : > { %v348_v7 = vld [vmem:[#allocation2 + $0x178] sm:$0xff] }
 0x1cd   : > { %1237 = vst [vmem:[#allocation2 + $0x38] sm:$0xff] %v1173_v14  ;;  %1269 = vst [vmem:[#allocation2 + $0x138] sm:$0xff] %v1205_v15 }
 0x1d0   : > { %v943_v20 = vpop.f32.mrb[16].mxu0  ;;  %v1071_v21 = vpop.f32.mrb[16].mxu1 }
 0x1d1   : > { %v1174_v24 = vadd.f32 %v943_v20, %v309_v18  ;;  %v1206_v25 = vadd.f32 %v1071_v21, %v341_v19  ;;  %v945_v26 = vpop.f32.mrb[17].mxu0  ;;  %v1073_v27 = vpop.f32.mrb[17].mxu1  ;;  %v317_v18 = vld [vmem:[#allocation2 + $0x80] sm:$0xff] }
 0x1d2   : > { %v946_v28 = vpop.f32.mrb[18].mxu0  ;;  %v1074_v29 = vpop.f32.mrb[18].mxu1  ;;  %v349_v19 = vld [vmem:[#allocation2 + $0x180] sm:$0xff] }
 0x1d3   : > { %1238 = vst [vmem:[#allocation2 + $0x40] sm:$0xff] %v1174_v24  ;;  %1270 = vst [vmem:[#allocation2 + $0x140] sm:$0xff] %v1206_v25  ;;  %v1175_v30 = vadd.f32 %v946_v28, %v310_v22  ;;  %v1207_v31 = vadd.f32 %v1074_v29, %v342_v23  ;;  %v948_v32 = vpop.f32.mrb[19].mxu0  ;;  %v1076_v33 = vpop.f32.mrb[19].mxu1  ;;  %v318_v22 = vld [vmem:[#allocation2 + $0x88] sm:$0xff] }
 0x1d4   : > { %v350_v23 = vld [vmem:[#allocation2 + $0x188] sm:$0xff] }
 0x1d5   : > { %1239 = vst [vmem:[#allocation2 + $0x48] sm:$0xff] %v1175_v30  ;;  %1271 = vst [vmem:[#allocation2 + $0x148] sm:$0xff] %v1207_v31 }
 0x1d8   : > { %v951_v36 = vpop.f32.mrb[20].mxu0  ;;  %v1079_v37 = vpop.f32.mrb[20].mxu1 }
 0x1d9   : > { %v1176_v40 = vadd.f32 %v951_v36, %v311_v34  ;;  %v1208_v41 = vadd.f32 %v1079_v37, %v343_v35  ;;  %v953_v42 = vpop.f32.mrb[21].mxu0  ;;  %v1081_v43 = vpop.f32.mrb[21].mxu1  ;;  %v319_v34 = vld [vmem:[#allocation2 + $0x90] sm:$0xff] }
 0x1da   : > { %v954_v44 = vpop.f32.mrb[22].mxu0  ;;  %v1082_v45 = vpop.f32.mrb[22].mxu1  ;;  %v351_v35 = vld [vmem:[#allocation2 + $0x190] sm:$0xff] }
 0x1db   : > { %1240 = vst [vmem:[#allocation2 + $0x50] sm:$0xff] %v1176_v40  ;;  %1272 = vst [vmem:[#allocation2 + $0x150] sm:$0xff] %v1208_v41  ;;  %v1177_v46 = vadd.f32 %v954_v44, %v312_v38  ;;  %v1209_v47 = vadd.f32 %v1082_v45, %v344_v39  ;;  %v956_v48 = vpop.f32.mrb[23].mxu0  ;;  %v1084_v49 = vpop.f32.mrb[23].mxu1  ;;  %v320_v38 = vld [vmem:[#allocation2 + $0x98] sm:$0xff] }
 0x1dc   : > { %v352_v39 = vld [vmem:[#allocation2 + $0x198] sm:$0xff] }
 0x1dd   : > { %1241 = vst [vmem:[#allocation2 + $0x58] sm:$0xff] %v1177_v46  ;;  %1273 = vst [vmem:[#allocation2 + $0x158] sm:$0xff] %v1209_v47 }
 0x1e0   : > { %v959_v52 = vpop.f32.mrb[24].mxu0  ;;  %v1087_v53 = vpop.f32.mrb[24].mxu1 }
 0x1e1   : > { %v1178_v56 = vadd.f32 %v959_v52, %v313_v50  ;;  %v1210_v57 = vadd.f32 %v1087_v53, %v345_v51  ;;  %v961_v58 = vpop.f32.mrb[25].mxu0  ;;  %v1089_v59 = vpop.f32.mrb[25].mxu1  ;;  %v321_v50 = vld [vmem:[#allocation2 + $0xa0] sm:$0xff] }
 0x1e2   : > { %v962_v60 = vpop.f32.mrb[26].mxu0  ;;  %v1090_v61 = vpop.f32.mrb[26].mxu1  ;;  %v353_v51 = vld [vmem:[#allocation2 + $0x1a0] sm:$0xff] }
 0x1e3   : > { %1242 = vst [vmem:[#allocation2 + $0x60] sm:$0xff] %v1178_v56  ;;  %1274 = vst [vmem:[#allocation2 + $0x160] sm:$0xff] %v1210_v57  ;;  %v1179_v62 = vadd.f32 %v962_v60, %v314_v54  ;;  %v1211_v63 = vadd.f32 %v1090_v61, %v346_v55  ;;  %v964_v0 = vpop.f32.mrb[27].mxu0  ;;  %v1092_v1 = vpop.f32.mrb[27].mxu1  ;;  %v322_v54 = vld [vmem:[#allocation2 + $0xa8] sm:$0xff] }
 0x1e4   : > { %v354_v55 = vld [vmem:[#allocation2 + $0x1a8] sm:$0xff] }
 0x1e5   : > { %1243 = vst [vmem:[#allocation2 + $0x68] sm:$0xff] %v1179_v62  ;;  %1275 = vst [vmem:[#allocation2 + $0x168] sm:$0xff] %v1211_v63 }
 0x1e8   : > { %v967_v4 = vpop.f32.mrb[28].mxu0  ;;  %v1095_v5 = vpop.f32.mrb[28].mxu1 }
 0x1e9   : > { %v1180_v8 = vadd.f32 %v967_v4, %v315_v2  ;;  %v1212_v9 = vadd.f32 %v1095_v5, %v347_v3  ;;  %v969_v10 = vpop.f32.mrb[29].mxu0  ;;  %v1097_v11 = vpop.f32.mrb[29].mxu1  ;;  %v323_v2 = vld [vmem:[#allocation2 + $0xb0] sm:$0xff] }
 0x1ea   : > { %v970_v12 = vpop.f32.mrb[30].mxu0  ;;  %v1098_v13 = vpop.f32.mrb[30].mxu1  ;;  %v355_v3 = vld [vmem:[#allocation2 + $0x1b0] sm:$0xff] }
 0x1eb   : > { %1244 = vst [vmem:[#allocation2 + $0x70] sm:$0xff] %v1180_v8  ;;  %1276 = vst [vmem:[#allocation2 + $0x170] sm:$0xff] %v1212_v9  ;;  %v1181_v14 = vadd.f32 %v970_v12, %v316_v6  ;;  %v1213_v15 = vadd.f32 %v1098_v13, %v348_v7  ;;  %v972_v16 = vpop.f32.mrb[31].mxu0  ;;  %v1100_v17 = vpop.f32.mrb[31].mxu1  ;;  %v324_v6 = vld [vmem:[#allocation2 + $0xb8] sm:$0xff] }
 0x1ec   : > { %v356_v7 = vld [vmem:[#allocation2 + $0x1b8] sm:$0xff] }
 0x1ed   : > { %1245 = vst [vmem:[#allocation2 + $0x78] sm:$0xff] %v1181_v14  ;;  %1277 = vst [vmem:[#allocation2 + $0x178] sm:$0xff] %v1213_v15 }
 0x1f0   : > { %v975_v20 = vpop.f32.mrb[32].mxu0  ;;  %v1103_v21 = vpop.f32.mrb[32].mxu1 }
 0x1f1   : > { %v1182_v24 = vadd.f32 %v975_v20, %v317_v18  ;;  %v1214_v25 = vadd.f32 %v1103_v21, %v349_v19  ;;  %v977_v26 = vpop.f32.mrb[33].mxu0  ;;  %v1105_v27 = vpop.f32.mrb[33].mxu1  ;;  %v325_v18 = vld [vmem:[#allocation2 + $0xc0] sm:$0xff] }
 0x1f2   : > { %v978_v28 = vpop.f32.mrb[34].mxu0  ;;  %v1106_v29 = vpop.f32.mrb[34].mxu1  ;;  %v357_v19 = vld [vmem:[#allocation2 + $0x1c0] sm:$0xff] }
 0x1f3   : > { %1246 = vst [vmem:[#allocation2 + $0x80] sm:$0xff] %v1182_v24  ;;  %1278 = vst [vmem:[#allocation2 + $0x180] sm:$0xff] %v1214_v25  ;;  %v1183_v30 = vadd.f32 %v978_v28, %v318_v22  ;;  %v1215_v31 = vadd.f32 %v1106_v29, %v350_v23  ;;  %v980_v32 = vpop.f32.mrb[35].mxu0  ;;  %v1108_v33 = vpop.f32.mrb[35].mxu1  ;;  %v326_v22 = vld [vmem:[#allocation2 + $0xc8] sm:$0xff] }
 0x1f4   : > { %v358_v23 = vld [vmem:[#allocation2 + $0x1c8] sm:$0xff] }
 0x1f5   : > { %1247 = vst [vmem:[#allocation2 + $0x88] sm:$0xff] %v1183_v30  ;;  %1279 = vst [vmem:[#allocation2 + $0x188] sm:$0xff] %v1215_v31 }
 0x1f8   : > { %v983_v36 = vpop.f32.mrb[36].mxu0  ;;  %v1111_v37 = vpop.f32.mrb[36].mxu1 }
 0x1f9   : > { %v1184_v40 = vadd.f32 %v983_v36, %v319_v34  ;;  %v1216_v41 = vadd.f32 %v1111_v37, %v351_v35  ;;  %v985_v42 = vpop.f32.mrb[37].mxu0  ;;  %v1113_v43 = vpop.f32.mrb[37].mxu1  ;;  %v327_v34 = vld [vmem:[#allocation2 + $0xd0] sm:$0xff] }
 0x1fa   : > { %v986_v44 = vpop.f32.mrb[38].mxu0  ;;  %v1114_v45 = vpop.f32.mrb[38].mxu1  ;;  %v359_v35 = vld [vmem:[#allocation2 + $0x1d0] sm:$0xff] }
 0x1fb   : > { %1248 = vst [vmem:[#allocation2 + $0x90] sm:$0xff] %v1184_v40  ;;  %1280 = vst [vmem:[#allocation2 + $0x190] sm:$0xff] %v1216_v41  ;;  %v1185_v46 = vadd.f32 %v986_v44, %v320_v38  ;;  %v1217_v47 = vadd.f32 %v1114_v45, %v352_v39  ;;  %v988_v48 = vpop.f32.mrb[39].mxu0  ;;  %v1116_v49 = vpop.f32.mrb[39].mxu1  ;;  %v328_v38 = vld [vmem:[#allocation2 + $0xd8] sm:$0xff] }
 0x1fc   : > { %v360_v39 = vld [vmem:[#allocation2 + $0x1d8] sm:$0xff] }
 0x1fd   : > { %1249 = vst [vmem:[#allocation2 + $0x98] sm:$0xff] %v1185_v46  ;;  %1281 = vst [vmem:[#allocation2 + $0x198] sm:$0xff] %v1217_v47 }
 0x200   : > { %v991_v52 = vpop.f32.mrb[40].mxu0  ;;  %v1119_v53 = vpop.f32.mrb[40].mxu1 }
 0x201   : > { %v1186_v56 = vadd.f32 %v991_v52, %v321_v50  ;;  %v1218_v57 = vadd.f32 %v1119_v53, %v353_v51  ;;  %v993_v58 = vpop.f32.mrb[41].mxu0  ;;  %v1121_v59 = vpop.f32.mrb[41].mxu1  ;;  %v329_v50 = vld [vmem:[#allocation2 + $0xe0] sm:$0xff] }
 0x202   : > { %v994_v60 = vpop.f32.mrb[42].mxu0  ;;  %v1122_v61 = vpop.f32.mrb[42].mxu1  ;;  %v361_v51 = vld [vmem:[#allocation2 + $0x1e0] sm:$0xff] }
 0x203   : > { %1250 = vst [vmem:[#allocation2 + $0xa0] sm:$0xff] %v1186_v56  ;;  %1282 = vst [vmem:[#allocation2 + $0x1a0] sm:$0xff] %v1218_v57  ;;  %v1187_v62 = vadd.f32 %v994_v60, %v322_v54  ;;  %v1219_v63 = vadd.f32 %v1122_v61, %v354_v55  ;;  %v996_v0 = vpop.f32.mrb[43].mxu0  ;;  %v1124_v1 = vpop.f32.mrb[43].mxu1  ;;  %v330_v54 = vld [vmem:[#allocation2 + $0xe8] sm:$0xff] }
 0x204   : > { %v362_v55 = vld [vmem:[#allocation2 + $0x1e8] sm:$0xff] }
 0x205   : > { %1251 = vst [vmem:[#allocation2 + $0xa8] sm:$0xff] %v1187_v62  ;;  %1283 = vst [vmem:[#allocation2 + $0x1a8] sm:$0xff] %v1219_v63 }
 0x208   : > { %v999_v4 = vpop.f32.mrb[44].mxu0  ;;  %v1127_v5 = vpop.f32.mrb[44].mxu1 }
 0x209   : > { %v1188_v8 = vadd.f32 %v999_v4, %v323_v2  ;;  %v1220_v9 = vadd.f32 %v1127_v5, %v355_v3  ;;  %v1001_v10 = vpop.f32.mrb[45].mxu0  ;;  %v1129_v11 = vpop.f32.mrb[45].mxu1  ;;  %v331_v2 = vld [vmem:[#allocation2 + $0xf0] sm:$0xff] }
 0x20a   : > { %v1002_v12 = vpop.f32.mrb[46].mxu0  ;;  %v1130_v13 = vpop.f32.mrb[46].mxu1  ;;  %v363_v3 = vld [vmem:[#allocation2 + $0x1f0] sm:$0xff] }
 0x20b   : > { %1252 = vst [vmem:[#allocation2 + $0xb0] sm:$0xff] %v1188_v8  ;;  %1284 = vst [vmem:[#allocation2 + $0x1b0] sm:$0xff] %v1220_v9  ;;  %v1189_v14 = vadd.f32 %v1002_v12, %v324_v6  ;;  %v1221_v15 = vadd.f32 %v1130_v13, %v356_v7  ;;  %v1004_v16 = vpop.f32.mrb[47].mxu0  ;;  %v1132_v17 = vpop.f32.mrb[47].mxu1  ;;  %v332_v6 = vld [vmem:[#allocation2 + $0xf8] sm:$0xff] }
 0x20c   : > { %v364_v7 = vld [vmem:[#allocation2 + $0x1f8] sm:$0xff] }
 0x20d   : > { %1253 = vst [vmem:[#allocation2 + $0xb8] sm:$0xff] %v1189_v14  ;;  %1285 = vst [vmem:[#allocation2 + $0x1b8] sm:$0xff] %v1221_v15 }
 0x210   : > { %v1007_v20 = vpop.f32.mrb[48].mxu0  ;;  %v1135_v21 = vpop.f32.mrb[48].mxu1 }
 0x211   : > { %v1190_v24 = vadd.f32 %v1007_v20, %v325_v18  ;;  %v1222_v25 = vadd.f32 %v1135_v21, %v357_v19  ;;  %v1009_v26 = vpop.f32.mrb[49].mxu0  ;;  %v1137_v27 = vpop.f32.mrb[49].mxu1 }
 0x212   : > { %v1010_v28 = vpop.f32.mrb[50].mxu0  ;;  %v1138_v29 = vpop.f32.mrb[50].mxu1 }
 0x213   : > { %1254 = vst [vmem:[#allocation2 + $0xc0] sm:$0xff] %v1190_v24  ;;  %1286 = vst [vmem:[#allocation2 + $0x1c0] sm:$0xff] %v1222_v25  ;;  %v1191_v30 = vadd.f32 %v1010_v28, %v326_v22  ;;  %v1223_v31 = vadd.f32 %v1138_v29, %v358_v23  ;;  %v1012_v32 = vpop.f32.mrb[51].mxu0  ;;  %v1140_v33 = vpop.f32.mrb[51].mxu1 }
 0x215   : > { %1255 = vst [vmem:[#allocation2 + $0xc8] sm:$0xff] %v1191_v30  ;;  %1287 = vst [vmem:[#allocation2 + $0x1c8] sm:$0xff] %v1223_v31 }
 0x218   : > { %v1015_v36 = vpop.f32.mrb[52].mxu0  ;;  %v1143_v37 = vpop.f32.mrb[52].mxu1 }
 0x219   : > { %v1192_v40 = vadd.f32 %v1015_v36, %v327_v34  ;;  %v1224_v41 = vadd.f32 %v1143_v37, %v359_v35  ;;  %v1017_v42 = vpop.f32.mrb[53].mxu0  ;;  %v1145_v43 = vpop.f32.mrb[53].mxu1 }
 0x21a   : > { %v1018_v44 = vpop.f32.mrb[54].mxu0  ;;  %v1146_v45 = vpop.f32.mrb[54].mxu1 }
 0x21b   : > { %1256 = vst [vmem:[#allocation2 + $0xd0] sm:$0xff] %v1192_v40  ;;  %1288 = vst [vmem:[#allocation2 + $0x1d0] sm:$0xff] %v1224_v41  ;;  %v1193_v46 = vadd.f32 %v1018_v44, %v328_v38  ;;  %v1225_v47 = vadd.f32 %v1146_v45, %v360_v39  ;;  %v1020_v48 = vpop.f32.mrb[55].mxu0  ;;  %v1148_v49 = vpop.f32.mrb[55].mxu1 }
 0x21d   : > { %1257 = vst [vmem:[#allocation2 + $0xd8] sm:$0xff] %v1193_v46  ;;  %1289 = vst [vmem:[#allocation2 + $0x1d8] sm:$0xff] %v1225_v47 }
 0x220   : > { %v1023_v52 = vpop.f32.mrb[56].mxu0  ;;  %v1151_v53 = vpop.f32.mrb[56].mxu1 }
 0x221   : > { %v1194_v56 = vadd.f32 %v1023_v52, %v329_v50  ;;  %v1226_v57 = vadd.f32 %v1151_v53, %v361_v51  ;;  %v1025_v58 = vpop.f32.mrb[57].mxu0  ;;  %v1153_v59 = vpop.f32.mrb[57].mxu1 }
 0x222   : > { %v1026_v60 = vpop.f32.mrb[58].mxu0  ;;  %v1154_v61 = vpop.f32.mrb[58].mxu1 }
 0x223   : > { %1258 = vst [vmem:[#allocation2 + $0xe0] sm:$0xff] %v1194_v56  ;;  %1290 = vst [vmem:[#allocation2 + $0x1e0] sm:$0xff] %v1226_v57  ;;  %v1195_v62 = vadd.f32 %v1026_v60, %v330_v54  ;;  %v1227_v63 = vadd.f32 %v1154_v61, %v362_v55  ;;  %v1028_v0 = vpop.f32.mrb[59].mxu0  ;;  %v1156_v1 = vpop.f32.mrb[59].mxu1 }
 0x225   : > { %1259 = vst [vmem:[#allocation2 + $0xe8] sm:$0xff] %v1195_v62  ;;  %1291 = vst [vmem:[#allocation2 + $0x1e8] sm:$0xff] %v1227_v63 }
 0x227   : > { %1297 = sbr.rel (%p2251_p7) target bundleno = 917 (0x395), region = 44 }
 0x228   : > { %v1031_v4 = vpop.f32.mrb[60].mxu0  ;;  %v1159_v5 = vpop.f32.mrb[60].mxu1 }
 0x229   : > { %v1196_v8 = vadd.f32 %v1031_v4, %v331_v2  ;;  %v1228_v9 = vadd.f32 %v1159_v5, %v363_v3  ;;  %v1033_v10 = vpop.f32.mrb[61].mxu0  ;;  %v1161_v11 = vpop.f32.mrb[61].mxu1 }
 0x22a   : > { %v1034_v12 = vpop.f32.mrb[62].mxu0  ;;  %v1162_v13 = vpop.f32.mrb[62].mxu1 }
 0x22b   : > { %1260 = vst [vmem:[#allocation2 + $0xf0] sm:$0xff] %v1196_v8  ;;  %1292 = vst [vmem:[#allocation2 + $0x1f0] sm:$0xff] %v1228_v9  ;;  %v1197_v14 = vadd.f32 %v1034_v12, %v332_v6  ;;  %v1229_v15 = vadd.f32 %v1162_v13, %v364_v7  ;;  %v1036_v16 = vpop.f32.mrb[63].mxu0  ;;  %v1164_v17 = vpop.f32.mrb[63].mxu1 }
 0x22d   : > { %1261 = vst [vmem:[#allocation2 + $0xf8] sm:$0xff] %v1197_v14  ;;  %1293 = vst [vmem:[#allocation2 + $0x1f8] sm:$0xff] %v1229_v15 }
 0x22e   : > { %v3222_v18 = vld [vmem:[#allocation2] sm:$0xff]  ;;  %v3224_v19 = vld [vmem:[#allocation2 + $0x8] sm:$0xff]  ;;  %v3226_v20 = vld [vmem:[#allocation2 + $0x10] sm:$0xff] }
 0x22f   : > { %v3228_v21 = vld [vmem:[#allocation2 + $0x18] sm:$0xff]  ;;  %v1362_v22 = vadd.f32 %v3224_v19, %v3222_v18  ;;  %v1432_v23 = vmul.f32 %v3222_v18, %v3222_v18  ;;  %v1433_v24 = vmul.f32 %v3224_v19, %v3224_v19  ;;  %v1434_v25 = vmul.f32 %v3226_v20, %v3226_v20  ;;  %v3238_v26 = vld [vmem:[#allocation2 + $0x20] sm:$0xff]  ;;  %v3243_v30 = vld [vmem:[#allocation2 + $0x28] sm:$0xff] }
 0x230   : > { %v1435_v28 = vmul.f32 %v3228_v21, %v3228_v21  ;;  %v1436_v32 = vmul.f32 %v3238_v26, %v3238_v26  ;;  %v3248_v34 = vld [vmem:[#allocation2 + $0x30] sm:$0xff]  ;;  %v1437_v36 = vmul.f32 %v3243_v30, %v3243_v30  ;;  %v3253_v38 = vld [vmem:[#allocation2 + $0x38] sm:$0xff]  ;;  %v3258_v42 = vld [vmem:[#allocation2 + $0x40] sm:$0xff] }
 0x231   : > { %v1363_v27 = vadd.f32 %v1362_v22, %v3226_v20  ;;  %v1496_v29 = vadd.f32 %v1433_v24, %v1432_v23  ;;  %v1438_v40 = vmul.f32 %v3248_v34, %v3248_v34  ;;  %v1439_v44 = vmul.f32 %v3253_v38, %v3253_v38  ;;  %v3263_v46 = vld [vmem:[#allocation2 + $0x48] sm:$0xff]  ;;  %v3268_v50 = vld [vmem:[#allocation2 + $0x50] sm:$0xff]  ;;  %v3273_v54 = vld [vmem:[#allocation2 + $0x58] sm:$0xff] }
 0x232   : > { %v1440_v48 = vmul.f32 %v3258_v42, %v3258_v42  ;;  %v1441_v52 = vmul.f32 %v3263_v46, %v3263_v46  ;;  %v1442_v56 = vmul.f32 %v3268_v50, %v3268_v50  ;;  %v3278_v58 = vld [vmem:[#allocation2 + $0x60] sm:$0xff]  ;;  %v1443_v60 = vmul.f32 %v3273_v54, %v3273_v54  ;;  %v3283_v62 = vld [vmem:[#allocation2 + $0x68] sm:$0xff]  ;;  %v3288_v2 = vld [vmem:[#allocation2 + $0x70] sm:$0xff] }
 0x233   : > { %v1364_v31 = vadd.f32 %v1363_v27, %v3228_v21  ;;  %v1497_v33 = vadd.f32 %v1496_v29, %v1434_v25  ;;  %v1444_v0 = vmul.f32 %v3278_v58, %v3278_v58  ;;  %v1445_v4 = vmul.f32 %v3283_v62, %v3283_v62  ;;  %v3293_v6 = vld [vmem:[#allocation2 + $0x78] sm:$0xff]  ;;  %v3298_v10 = vld [vmem:[#allocation2 + $0x80] sm:$0xff]  ;;  %v3303_v14 = vld [vmem:[#allocation2 + $0x88] sm:$0xff] }
 0x234   : > { %v1446_v8 = vmul.f32 %v3288_v2, %v3288_v2  ;;  %v1447_v12 = vmul.f32 %v3293_v6, %v3293_v6  ;;  %v1448_v16 = vmul.f32 %v3298_v10, %v3298_v10  ;;  %v3308_v22 = vld [vmem:[#allocation2 + $0x90] sm:$0xff]  ;;  %v1449_v24 = vmul.f32 %v3303_v14, %v3303_v14  ;;  %v3313_v27 = vld [vmem:[#allocation2 + $0x98] sm:$0xff] }
 0x235   : > { %v1365_v35 = vadd.f32 %v1364_v31, %v3238_v26  ;;  %v1498_v37 = vadd.f32 %v1497_v33, %v1435_v28  ;;  %v1450_v29 = vmul.f32 %v3308_v22, %v3308_v22 }
 0x237   : > { %v1366_v39 = vadd.f32 %v1365_v35, %v3243_v30  ;;  %v1499_v41 = vadd.f32 %v1498_v37, %v1436_v32  ;;  %v3318_v32 = vld [vmem:[#allocation2 + $0xa0] sm:$0xff]  ;;  %v1451_v35 = vmul.f32 %v3313_v27, %v3313_v27  ;;  %v3323_v37 = vld [vmem:[#allocation2 + $0xa8] sm:$0xff] }
 0x239   : > { %v1367_v43 = vadd.f32 %v1366_v39, %v3248_v34  ;;  %v1500_v45 = vadd.f32 %v1499_v41, %v1437_v36 }
 0x23b   : > { %v1368_v47 = vadd.f32 %v1367_v43, %v3253_v38  ;;  %v1501_v49 = vadd.f32 %v1500_v45, %v1438_v40  ;;  %v1452_v40 = vmul.f32 %v3318_v32, %v3318_v32  ;;  %v3328_v43 = vld [vmem:[#allocation2 + $0xb0] sm:$0xff]  ;;  %v1453_v45 = vmul.f32 %v3323_v37, %v3323_v37 }
 0x23d   : > { %v1369_v51 = vadd.f32 %v1368_v47, %v3258_v42  ;;  %v1502_v53 = vadd.f32 %v1501_v49, %v1439_v44 }
 0x23f   : > { %v1370_v55 = vadd.f32 %v1369_v51, %v3263_v46  ;;  %v1503_v57 = vadd.f32 %v1502_v53, %v1440_v48  ;;  %v3333_v48 = vld [vmem:[#allocation2 + $0xb8] sm:$0xff]  ;;  %v1454_v51 = vmul.f32 %v3328_v43, %v3328_v43  ;;  %v3338_v53 = vld [vmem:[#allocation2 + $0xc0] sm:$0xff] }
 0x241   : > { %v1371_v59 = vadd.f32 %v1370_v55, %v3268_v50  ;;  %v1504_v61 = vadd.f32 %v1503_v57, %v1441_v52 }
 0x243   : > { %v1372_v63 = vadd.f32 %v1371_v59, %v3273_v54  ;;  %v1505_v1 = vadd.f32 %v1504_v61, %v1442_v56  ;;  %v1455_v56 = vmul.f32 %v3333_v48, %v3333_v48  ;;  %v3343_v59 = vld [vmem:[#allocation2 + $0xc8] sm:$0xff]  ;;  %v1456_v61 = vmul.f32 %v3338_v53, %v3338_v53 }
 0x245   : > { %v1373_v3 = vadd.f32 %v1372_v63, %v3278_v58  ;;  %v1506_v5 = vadd.f32 %v1505_v1, %v1443_v60 }
 0x247   : > { %v1374_v7 = vadd.f32 %v1373_v3, %v3283_v62  ;;  %v1507_v9 = vadd.f32 %v1506_v5, %v1444_v0  ;;  %v3348_v0 = vld [vmem:[#allocation2 + $0xd0] sm:$0xff]  ;;  %v1457_v3 = vmul.f32 %v3343_v59, %v3343_v59  ;;  %v3353_v5 = vld [vmem:[#allocation2 + $0xd8] sm:$0xff] }
 0x249   : > { %v1375_v11 = vadd.f32 %v1374_v7, %v3288_v2  ;;  %v1508_v13 = vadd.f32 %v1507_v9, %v1445_v4 }
 0x24b   : > { %v1376_v15 = vadd.f32 %v1375_v11, %v3293_v6  ;;  %v1509_v17 = vadd.f32 %v1508_v13, %v1446_v8  ;;  %v1458_v8 = vmul.f32 %v3348_v0, %v3348_v0  ;;  %v3358_v11 = vld [vmem:[#allocation2 + $0xe0] sm:$0xff]  ;;  %v1459_v13 = vmul.f32 %v3353_v5, %v3353_v5 }
 0x24d   : > { %v1377_v23 = vadd.f32 %v1376_v15, %v3298_v10  ;;  %v1510_v25 = vadd.f32 %v1509_v17, %v1447_v12 }
 0x24f   : > { %v1378_v28 = vadd.f32 %v1377_v23, %v3303_v14  ;;  %v1511_v31 = vadd.f32 %v1510_v25, %v1448_v16  ;;  %v3363_v16 = vld [vmem:[#allocation2 + $0xe8] sm:$0xff]  ;;  %v1460_v23 = vmul.f32 %v3358_v11, %v3358_v11  ;;  %v3368_v25 = vld [vmem:[#allocation2 + $0xf0] sm:$0xff] }
 0x251   : > { %v1379_v33 = vadd.f32 %v1378_v28, %v3308_v22  ;;  %v1512_v36 = vadd.f32 %v1511_v31, %v1449_v24 }
 0x253   : > { %v1380_v39 = vadd.f32 %v1379_v33, %v3313_v27  ;;  %v1513_v41 = vadd.f32 %v1512_v36, %v1450_v29  ;;  %v1461_v29 = vmul.f32 %v3363_v16, %v3363_v16  ;;  %v3373_v33 = vld [vmem:[#allocation2 + $0xf8] sm:$0xff]  ;;  %v1462_v36 = vmul.f32 %v3368_v25, %v3368_v25 }
 0x255   : > { %v1381_v44 = vadd.f32 %v1380_v39, %v3318_v32  ;;  %v1514_v47 = vadd.f32 %v1513_v41, %v1451_v35 }
 0x257   : > { %v1382_v49 = vadd.f32 %v1381_v44, %v3323_v37  ;;  %v1515_v52 = vadd.f32 %v1514_v47, %v1452_v40  ;;  %v3378_v40 = vld [vmem:[#allocation2 + $0x100] sm:$0xff]  ;;  %v1463_v44 = vmul.f32 %v3373_v33, %v3373_v33  ;;  %v3383_v47 = vld [vmem:[#allocation2 + $0x108] sm:$0xff] }
 0x259   : > { %v1383_v55 = vadd.f32 %v1382_v49, %v3328_v43  ;;  %v1516_v57 = vadd.f32 %v1515_v52, %v1453_v45 }
 0x25b   : > { %v1384_v60 = vadd.f32 %v1383_v55, %v3333_v48  ;;  %v1517_v63 = vadd.f32 %v1516_v57, %v1454_v51  ;;  %v1464_v51 = vmul.f32 %v3378_v40, %v3378_v40  ;;  %v3388_v55 = vld [vmem:[#allocation2 + $0x110] sm:$0xff]  ;;  %v1465_v57 = vmul.f32 %v3383_v47, %v3383_v47 }
 0x25d   : > { %v1385_v1 = vadd.f32 %v1384_v60, %v3338_v53  ;;  %v1518_v4 = vadd.f32 %v1517_v63, %v1455_v56 }
 0x25f   : > { %v1386_v7 = vadd.f32 %v1385_v1, %v3343_v59  ;;  %v1519_v9 = vadd.f32 %v1518_v4, %v1456_v61  ;;  %v3393_v61 = vld [vmem:[#allocation2 + $0x118] sm:$0xff]  ;;  %v1466_v1 = vmul.f32 %v3388_v55, %v3388_v55  ;;  %v3398_v4 = vld [vmem:[#allocation2 + $0x120] sm:$0xff] }
 0x260   : > { %4086 = vst [vmem:[#allocation16_spill] sm:$0xff] %v3398_v4 }
 0x261   : > { %v1387_v12 = vadd.f32 %v1386_v7, %v3348_v0  ;;  %v1520_v15 = vadd.f32 %v1519_v9, %v1457_v3 }
 0x263   : > { %v1388_v17 = vadd.f32 %v1387_v12, %v3353_v5  ;;  %v1521_v24 = vadd.f32 %v1520_v15, %v1458_v8  ;;  %v1467_v8 = vmul.f32 %v3393_v61, %v3393_v61  ;;  %v3403_v12 = vld [vmem:[#allocation2 + $0x128] sm:$0xff]  ;;  %v1468_v15 = vmul.f32 %v3398_v4, %v3398_v4 }
 0x264   : > { %4087 = vst [vmem:[#allocation17_spill] sm:$0xff] %v3403_v12 }
 0x265   : > { %v1389_v28 = vadd.f32 %v1388_v17, %v3358_v11  ;;  %v1522_v31 = vadd.f32 %v1521_v24, %v1459_v13 }
 0x267   : > { %v1390_v35 = vadd.f32 %v1389_v28, %v3363_v16  ;;  %v1523_v39 = vadd.f32 %v1522_v31, %v1460_v23  ;;  %v3408_v23 = vld [vmem:[#allocation2 + $0x130] sm:$0xff]  ;;  %v1469_v28 = vmul.f32 %v3403_v12, %v3403_v12  ;;  %v3413_v31 = vld [vmem:[#allocation2 + $0x138] sm:$0xff] }
 0x268   : > { %4088 = vst [vmem:[#allocation18_spill] sm:$0xff] %v3408_v23  ;;  %4089 = vst [vmem:[#allocation19_spill] sm:$0xff] %v3413_v31 }
 0x269   : > { %v1391_v41 = vadd.f32 %v1390_v35, %v3368_v25  ;;  %v1524_v45 = vadd.f32 %v1523_v39, %v1461_v29 }
 0x26b   : > { %v1392_v49 = vadd.f32 %v1391_v41, %v3373_v33  ;;  %v1525_v52 = vadd.f32 %v1524_v45, %v1462_v36  ;;  %v1470_v36 = vmul.f32 %v3408_v23, %v3408_v23  ;;  %v3418_v41 = vld [vmem:[#allocation2 + $0x140] sm:$0xff]  ;;  %v1471_v45 = vmul.f32 %v3413_v31, %v3413_v31 }
 0x26c   : > { %4090 = vst [vmem:[#allocation20_spill] sm:$0xff] %v3418_v41 }
 0x26d   : > { %v1393_v56 = vadd.f32 %v1392_v49, %v3378_v40  ;;  %v1526_v60 = vadd.f32 %v1525_v52, %v1463_v44 }
 0x26f   : > { %v1394_v63 = vadd.f32 %v1393_v56, %v3383_v47  ;;  %v1527_v3 = vadd.f32 %v1526_v60, %v1464_v51  ;;  %v3423_v51 = vld [vmem:[#allocation2 + $0x148] sm:$0xff]  ;;  %v1472_v56 = vmul.f32 %v3418_v41, %v3418_v41  ;;  %v3428_v60 = vld [vmem:[#allocation2 + $0x150] sm:$0xff] }
 0x270   : > { %4091 = vst [vmem:[#allocation21_spill] sm:$0xff] %v3423_v51  ;;  %4092 = vst [vmem:[#allocation22_spill] sm:$0xff] %v3428_v60 }
 0x271   : > { %v1395_v7 = vadd.f32 %v1394_v63, %v3388_v55  ;;  %v1528_v9 = vadd.f32 %v1527_v3, %v1465_v57 }
 0x273   : > { %v1396_v13 = vadd.f32 %v1395_v7, %v3393_v61  ;;  %v1529_v17 = vadd.f32 %v1528_v9, %v1466_v1  ;;  %v1473_v1 = vmul.f32 %v3423_v51, %v3423_v51  ;;  %v3433_v7 = vld [vmem:[#allocation2 + $0x158] sm:$0xff]  ;;  %v1474_v9 = vmul.f32 %v3428_v60, %v3428_v60 }
 0x274   : > { %4093 = vst [vmem:[#allocation23_spill] sm:$0xff] %v3433_v7 }
 0x275   : > { %v1397_v24 = vadd.f32 %v1396_v13, %v3398_v4  ;;  %v1530_v29 = vadd.f32 %v1529_v17, %v1467_v8 }
 0x277   : > { %v1398_v35 = vadd.f32 %v1397_v24, %v3403_v12  ;;  %v1531_v39 = vadd.f32 %v1530_v29, %v1468_v15  ;;  %v3438_v15 = vld [vmem:[#allocation2 + $0x160] sm:$0xff]  ;;  %v1475_v24 = vmul.f32 %v3433_v7, %v3433_v7  ;;  %v3443_v29 = vld [vmem:[#allocation2 + $0x168] sm:$0xff] }
 0x278   : > { %4094 = vst [vmem:[#allocation24_spill] sm:$0xff] %v3438_v15  ;;  %4095 = vst [vmem:[#allocation25_spill] sm:$0xff] %v3443_v29 }
 0x279   : > { %v1399_v44 = vadd.f32 %v1398_v35, %v3408_v23  ;;  %v1532_v49 = vadd.f32 %v1531_v39, %v1469_v28 }
 0x27b   : > { %v1400_v52 = vadd.f32 %v1399_v44, %v3413_v31  ;;  %v1533_v57 = vadd.f32 %v1532_v49, %v1470_v36  ;;  %v1476_v36 = vmul.f32 %v3438_v15, %v3438_v15  ;;  %v3448_v44 = vld [vmem:[#allocation2 + $0x170] sm:$0xff]  ;;  %v1477_v49 = vmul.f32 %v3443_v29, %v3443_v29  ;;  %v3518_v31 = vld [vmem:[#allocation2 + $0x1e0] sm:$0xff] }
 0x27c   : > { %4096 = vst [vmem:[#allocation26_spill] sm:$0xff] %v3448_v44  ;;  %4105 = vst [vmem:[#allocation35_spill] sm:$0xff] %v3518_v31 }
 0x27d   : > { %v1401_v63 = vadd.f32 %v1400_v52, %v3418_v41  ;;  %v1534_v3 = vadd.f32 %v1533_v57, %v1471_v45  ;;  %v3513_v41 = vld [vmem:[#allocation2 + $0x1d8] sm:$0xff] }
 0x27e   : > { %4104 = vst [vmem:[#allocation34_spill] sm:$0xff] %v3513_v41 }
 0x27f   : > { %v1402_v8 = vadd.f32 %v1401_v63, %v3423_v51  ;;  %v1535_v13 = vadd.f32 %v1534_v3, %v1472_v56  ;;  %v3453_v56 = vld [vmem:[#allocation2 + $0x178] sm:$0xff]  ;;  %v1478_v63 = vmul.f32 %v3448_v44, %v3448_v44  ;;  %v3458_v3 = vld [vmem:[#allocation2 + $0x180] sm:$0xff]  ;;  %v3508_v51 = vld [vmem:[#allocation2 + $0x1d0] sm:$0xff] }
 0x280   : > { %4097 = vst [vmem:[#allocation27_spill] sm:$0xff] %v3453_v56  ;;  %4103 = vst [vmem:[#allocation33_spill] sm:$0xff] %v3508_v51 }
 0x281   : > { %v1403_v17 = vadd.f32 %v1402_v8, %v3428_v60  ;;  %v1536_v28 = vadd.f32 %v1535_v13, %v1473_v1  ;;  %v3503_v60 = vld [vmem:[#allocation2 + $0x1c8] sm:$0xff] }
 0x282   : > { %4102 = vst [vmem:[#allocation32_spill] sm:$0xff] %v3503_v60 }
 0x283   : > { %v1404_v35 = vadd.f32 %v1403_v17, %v3433_v7  ;;  %v1537_v39 = vadd.f32 %v1536_v28, %v1474_v9  ;;  %v1479_v9 = vmul.f32 %v3453_v56, %v3453_v56  ;;  %v3463_v17 = vld [vmem:[#allocation2 + $0x188] sm:$0xff]  ;;  %v1480_v28 = vmul.f32 %v3458_v3, %v3458_v3  ;;  %v3498_v7 = vld [vmem:[#allocation2 + $0x1c0] sm:$0xff] }
 0x284   : > { %4101 = vst [vmem:[#allocation31_spill] sm:$0xff] %v3498_v7 }
 0x285   : > { %v1405_v45 = vadd.f32 %v1404_v35, %v3438_v15  ;;  %v1538_v52 = vadd.f32 %v1537_v39, %v1475_v24  ;;  %v3468_v39 = vld [vmem:[#allocation2 + $0x190] sm:$0xff]  ;;  %v3493_v15 = vld [vmem:[#allocation2 + $0x1b8] sm:$0xff] }
 0x286   : > { %4100 = vst [vmem:[#allocation30_spill] sm:$0xff] %v3493_v15 }
 0x287   : > { %v1406_v57 = vadd.f32 %v1405_v45, %v3443_v29  ;;  %v1539_v1 = vadd.f32 %v1538_v52, %v1476_v36  ;;  %v1481_v45 = vmul.f32 %v3463_v17, %v3463_v17  ;;  %v3488_v29 = vld [vmem:[#allocation2 + $0x1b0] sm:$0xff] }
 0x288   : > { %4099 = vst [vmem:[#allocation29_spill] sm:$0xff] %v3488_v29 }
 0x289   : > { %v1407_v8 = vadd.f32 %v1406_v57, %v3448_v44  ;;  %v1540_v13 = vadd.f32 %v1539_v1, %v1477_v49  ;;  %v3473_v57 = vld [vmem:[#allocation2 + $0x198] sm:$0xff]  ;;  %v1482_v1 = vmul.f32 %v3468_v39, %v3468_v39  ;;  %v3483_v44 = vld [vmem:[#allocation2 + $0x1a8] sm:$0xff] }
 0x28a   : > { %4098 = vst [vmem:[#allocation28_spill] sm:$0xff] %v3483_v44 }
 0x28b   : > { %v1408_v24 = vadd.f32 %v1407_v8, %v3453_v56  ;;  %v1541_v35 = vadd.f32 %v1540_v13, %v1478_v63  ;;  %v3478_v56 = vld [vmem:[#allocation2 + $0x1a0] sm:$0xff]  ;;  %v1483_v13 = vmul.f32 %v3473_v57, %v3473_v57 }
 0x28d   : > { %v1409_v36 = vadd.f32 %v1408_v24, %v3458_v3  ;;  %v1542_v52 = vadd.f32 %v1541_v35, %v1479_v9  ;;  %v1484_v35 = vmul.f32 %v3478_v56, %v3478_v56 }
 0x28f   : > { %v1410_v49 = vadd.f32 %v1409_v36, %v3463_v17  ;;  %v1543_v8 = vadd.f32 %v1542_v52, %v1480_v28  ;;  %v1485_v52 = vmul.f32 %v3483_v44, %v3483_v44 }
 0x291   : > { %v1411_v63 = vadd.f32 %v1410_v49, %v3468_v39  ;;  %v1544_v24 = vadd.f32 %v1543_v8, %v1481_v45  ;;  %v1486_v8 = vmul.f32 %v3488_v29, %v3488_v29 }
 0x293   : > { %v1412_v9 = vadd.f32 %v1411_v63, %v3473_v57  ;;  %v1545_v36 = vadd.f32 %v1544_v24, %v1482_v1  ;;  %v1487_v24 = vmul.f32 %v3493_v15, %v3493_v15 }
 0x295   : > { %v1413_v28 = vadd.f32 %v1412_v9, %v3478_v56  ;;  %v1546_v49 = vadd.f32 %v1545_v36, %v1483_v13  ;;  %v1488_v36 = vmul.f32 %v3498_v7, %v3498_v7 }
 0x297   : > { %v1414_v45 = vadd.f32 %v1413_v28, %v3483_v44  ;;  %v1547_v63 = vadd.f32 %v1546_v49, %v1484_v35  ;;  %v1489_v49 = vmul.f32 %v3503_v60, %v3503_v60 }
 0x299   : > { %v1415_v1 = vadd.f32 %v1414_v45, %v3488_v29  ;;  %v1548_v9 = vadd.f32 %v1547_v63, %v1485_v52  ;;  %v1490_v63 = vmul.f32 %v3508_v51, %v3508_v51 }
 0x29b   : > { %v1416_v13 = vadd.f32 %v1415_v1, %v3493_v15  ;;  %v1549_v28 = vadd.f32 %v1548_v9, %v1486_v8  ;;  %v1491_v9 = vmul.f32 %v3513_v41, %v3513_v41 }
 0x29d   : > { %v1417_v35 = vadd.f32 %v1416_v13, %v3498_v7  ;;  %v1550_v45 = vadd.f32 %v1549_v28, %v1487_v24  ;;  %v3523_v7 = vld [vmem:[#allocation2 + $0x1e8] sm:$0xff]  ;;  %v1492_v28 = vmul.f32 %v3518_v31, %v3518_v31 }
 0x29e   : > { %4106 = vst [vmem:[#allocation36_spill] sm:$0xff] %v3523_v7 }
 0x29f   : > { %v1418_v52 = vadd.f32 %v1417_v35, %v3503_v60  ;;  %v1551_v1 = vadd.f32 %v1550_v45, %v1488_v36  ;;  %v3528_v60 = vld [vmem:[#allocation2 + $0x1f0] sm:$0xff]  ;;  %v1493_v45 = vmul.f32 %v3523_v7, %v3523_v7 }
 0x2a0   : > { %4107 = vst [vmem:[#allocation37_spill] sm:$0xff] %v3528_v60 }
 0x2a1   : > { %v1419_v8 = vadd.f32 %v1418_v52, %v3508_v51  ;;  %v1552_v13 = vadd.f32 %v1551_v1, %v1489_v49  ;;  %v3533_v51 = vld [vmem:[#allocation2 + $0x1f8] sm:$0xff]  ;;  %v1494_v1 = vmul.f32 %v3528_v60, %v3528_v60 }
 0x2a3   : > { %v1420_v24 = vadd.f32 %v1419_v8, %v3513_v41  ;;  %v1553_v35 = vadd.f32 %v1552_v13, %v1490_v63  ;;  %v1495_v63 = vmul.f32 %v3533_v51, %v3533_v51 }
 0x2a5   : > { %v1421_v36 = vadd.f32 %v1420_v24, %v3518_v31  ;;  %v1554_v52 = vadd.f32 %v1553_v35, %v1491_v9 }
 0x2a7   : > { %v1422_v49 = vadd.f32 %v1421_v36, %v3523_v7  ;;  %v1555_v8 = vadd.f32 %v1554_v52, %v1492_v28 }
 0x2a9   : > { %v1423_v41 = vadd.f32 %v1422_v49, %v3528_v60  ;;  %v1556_v13 = vadd.f32 %v1555_v8, %v1493_v45 }
 0x2ab   : > { %v1424_v24 = vadd.f32 %v1423_v41, %v3533_v51  ;;  %v1557_v31 = vadd.f32 %v1556_v13, %v1494_v1 }
 0x2ad   : > { %v1425_v15 = vrot.slane %v1424_v24, 4  ;;  %v1558_v23 = vadd.f32 %v1557_v31, %v1495_v63 }
 0x2af   : > { %v1426_v9 = vadd.f32 %v1425_v15, %v1424_v24  ;;  %v1559_v35 = vrot.slane %v1558_v23, 4 }
 0x2b1   : > { %v1427_v29 = vrot.slane %v1426_v9, 2  ;;  %v1560_v12 = vadd.f32 %v1559_v35, %v1558_v23 }
 0x2b3   : > { %v1428_v36 = vadd.f32 %v1427_v29, %v1426_v9  ;;  %v1561_v7 = vrot.slane %v1560_v12, 2 }
 0x2b5   : > { %v1429_v44 = vrot.slane %v1428_v36, 1  ;;  %v1562_v4 = vadd.f32 %v1561_v7, %v1560_v12 }
 0x2b7   : > { %v1430_v28 = vadd.f32 %v1429_v44, %v1428_v36  ;;  %v1563_v52 = vrot.slane %v1562_v4, 1 }
 0x2b9   : > { %v3542_v49 = vmul.f32 0.001953125, %v1430_v28  ;;  %v1564_v60 = vadd.f32 %v1563_v52, %v1562_v4 }
 0x2bb   : > { %v1566_v45 = vmul.f32 %v3542_v49, %v3542_v49  ;;  %v1565_v41 = vmul.f32 0.001953125, %v1564_v60  ;;  %v1587_v23 = vsub.f32 %v3298_v10, %v3542_v49  ;;  %v1571_v15 = vsub.f32 %v3222_v18, %v3542_v49 }
 0x2bc   : > { %v1588_v12 = vsub.f32 %v3303_v14, %v3542_v49  ;;  %v1572_v4 = vsub.f32 %v3224_v19, %v3542_v49  ;;  %v1589_v7 = vsub.f32 %v3308_v22, %v3542_v49  ;;  %v1573_v60 = vsub.f32 %v3226_v20, %v3542_v49 }
 0x2bd   : > { %v1567_v1 = vsub.f32 %v1565_v41, %v1566_v45  ;;  %v1590_v22 = vsub.f32 %v3313_v27, %v3542_v49  ;;  %v1574_v20 = vsub.f32 %v3228_v21, %v3542_v49  ;;  %v1591_v52 = vsub.f32 %v3318_v32, %v3542_v49 }
 0x2be   : > { %v1575_v41 = vsub.f32 %v3238_v26, %v3542_v49 }
 0x2bf   : > { %v1568_v8 = vmax.f32 %v1567_v1, 0.0 }
 0x2c1   : > { %v1569_v31 = vadd.f32 1e-05, %v1568_v8 }
 0x2c3   : > { %2541 = vrsqrt.f32 %v1569_v31 }
 0x2cd   : > { %v3558_v29 = vpop.eup %2541 }
 0x2ce   : > { %v1651_v44 = vmul.f32 %v3558_v29, %v1587_v23  ;;  %v1635_v10 = vmul.f32 %v3558_v29, %v1571_v15  ;;  %v1652_v18 = vmul.f32 %v3558_v29, %v1588_v12  ;;  %v1636_v63 = vmul.f32 %v3558_v29, %v1572_v4 }
 0x2cf   : > { %v1653_v14 = vmul.f32 %v3558_v29, %v1589_v7  ;;  %v1637_v19 = vmul.f32 %v3558_v29, %v1573_v60  ;;  %v1654_v27 = vmul.f32 %v3558_v29, %v1590_v22  ;;  %v1638_v21 = vmul.f32 %v3558_v29, %v1574_v20 }
 0x2d0   : > { %vm1715_vm0 = vcmp.ge.f32.partialorder %v1651_v44, 0.0  ;;  %v1779_v13 = vmul.f32 0.01, %v1651_v44  ;;  %vm1699_vm1 = vcmp.ge.f32.partialorder %v1635_v10, 0.0  ;;  %v1763_v24 = vmul.f32 0.01, %v1635_v10 }
 0x2d1   : > { %vm1716_vm2 = vcmp.ge.f32.partialorder %v1652_v18, 0.0  ;;  %v1780_v9 = vmul.f32 0.01, %v1652_v18  ;;  %vm1700_vm3 = vcmp.ge.f32.partialorder %v1636_v63, 0.0  ;;  %v1764_v35 = vmul.f32 0.01, %v1636_v63 }
 0x2d2   : > { %v1843_v36 = vsel %vm1715_vm0, %v1651_v44, %v1779_v13  ;;  %v1827_v28 = vsel %vm1699_vm1, %v1635_v10, %v1763_v24  ;;  %v1781_v45 = vmul.f32 0.01, %v1653_v14  ;;  %vm1717_vm4 = vcmp.ge.f32.partialorder %v1653_v14, 0.0 }
 0x2d3   : > { %1923 = vxpose.xlu1.b32.start [1/16] (narrow) %v1843_v36, 8  ;;  %1891 = vxpose.xlu0.b32.start [1/16] (narrow) %v1827_v28, 8  ;;  %v1844_v1 = vsel %vm1716_vm2, %v1652_v18, %v1780_v9  ;;  %v1828_v8 = vsel %vm1700_vm3, %v1636_v63, %v1764_v35  ;;  %v1765_v31 = vmul.f32 0.01, %v1637_v19  ;;  %vm1701_vm5 = vcmp.ge.f32.partialorder %v1637_v19, 0.0 }
 0x2d4   : > { %v1592_v23 = vsub.f32 %v3323_v37, %v3542_v49  ;;  %v1845_v32 = vsel %vm1717_vm4, %v1653_v14, %v1781_v45  ;;  %vm1718_vm6 = vcmp.ge.f32.partialorder %v1654_v27, 0.0  ;;  %v1782_v15 = vmul.f32 0.01, %v1654_v27 }
 0x2d5   : > { %v1576_v12 = vsub.f32 %v3243_v30, %v3542_v49  ;;  %v1829_v4 = vsel %vm1701_vm5, %v1637_v19, %v1765_v31  ;;  %v1766_v7 = vmul.f32 0.01, %v1638_v21  ;;  %v1655_v26 = vmul.f32 %v3558_v29, %v1591_v52 }
 0x2d6   : > { %v1639_v60 = vmul.f32 %v3558_v29, %v1575_v41  ;;  %vm1702_vm7 = vcmp.ge.f32.partialorder %v1638_v21, 0.0  ;;  %v1593_v44 = vsub.f32 %v3328_v43, %v3542_v49  ;;  %v1846_v37 = vsel %vm1718_vm6, %v1654_v27, %v1782_v15 }
 0x2d7   : > { %1924 = vxpose.xlu1.b32.cont [2/16] (narrow) %v1844_v1, 8  ;;  %1892 = vxpose.xlu0.b32.cont [2/16] (narrow) %v1828_v8, 8  ;;  %v1656_v10 = vmul.f32 %v3558_v29, %v1592_v23  ;;  %v1577_v18 = vsub.f32 %v3248_v34, %v3542_v49  ;;  %v1830_v63 = vsel %vm1702_vm7, %v1638_v21, %v1766_v7  ;;  %v1783_v30 = vmul.f32 0.01, %v1655_v26 }
 0x2d8   : > { %v1767_v14 = vmul.f32 0.01, %v1639_v60  ;;  %v1640_v19 = vmul.f32 %v3558_v29, %v1576_v12  ;;  %vm1719_vm8 = vcmp.ge.f32.partialorder %v1655_v26, 0.0  ;;  %vm1703_vm9 = vcmp.ge.f32.partialorder %v1639_v60, 0.0 }
 0x2d9   : > { %v1594_v22 = vsub.f32 %v3333_v48, %v3542_v49  ;;  %v1578_v43 = vsub.f32 %v3253_v38, %v3542_v49  ;;  %v1595_v20 = vsub.f32 %v3338_v53, %v3542_v49  ;;  %v1579_v13 = vsub.f32 %v3258_v42, %v3542_v49 }
 0x2da   : > { %v1784_v34 = vmul.f32 0.01, %v1656_v10  ;;  %v1657_v24 = vmul.f32 %v3558_v29, %v1593_v44  ;;  %v1596_v9 = vsub.f32 %v3343_v59, %v3542_v49  ;;  %v1580_v48 = vsub.f32 %v3263_v46, %v3542_v49 }
 0x2db   : > { %1925 = vxpose.xlu1.b32.cont [3/16] (narrow) %v1845_v32, 8  ;;  %1893 = vxpose.xlu0.b32.cont [3/16] (narrow) %v1829_v4, 8  ;;  %v1847_v35 = vsel %vm1719_vm8, %v1655_v26, %v1783_v30  ;;  %v1831_v36 = vsel %vm1703_vm9, %v1639_v60, %v1767_v14  ;;  %v1768_v38 = vmul.f32 0.01, %v1640_v19  ;;  %v1641_v28 = vmul.f32 %v3558_v29, %v1577_v18 }
 0x2dc   : > { %vm1720_vm10 = vcmp.ge.f32.partialorder %v1656_v10, 0.0  ;;  %vm1704_vm11 = vcmp.ge.f32.partialorder %v1640_v19, 0.0  ;;  %v1597_v42 = vsub.f32 %v3348_v0, %v3542_v49  ;;  %v1581_v53 = vsub.f32 %v3268_v50, %v3542_v49  ;;  %v4109_v0 = vld [vmem:[#allocation28_spill] sm:$0xff]  ;;  %v4110_v50 = vld [vmem:[#allocation17_spill] sm:$0xff] }
 0x2dd   : > { %v1598_v52 = vsub.f32 %v3353_v5, %v3542_v49  ;;  %v1582_v59 = vsub.f32 %v3273_v54, %v3542_v49  ;;  %v1599_v46 = vsub.f32 %v3358_v11, %v3542_v49  ;;  %v1583_v45 = vsub.f32 %v3278_v58, %v3542_v49  ;;  %v4113_v5 = vld [vmem:[#allocation30_spill] sm:$0xff]  ;;  %v4114_v54 = vld [vmem:[#allocation19_spill] sm:$0xff]  ;;  %v4118_v58 = vld [vmem:[#allocation21_spill] sm:$0xff] }
 0x2de   : > { %vm1721_vm12 = vcmp.ge.f32.partialorder %v1657_v24, 0.0  ;;  %v1785_v27 = vmul.f32 0.01, %v1657_v24  ;;  %v1658_v21 = vmul.f32 %v3558_v29, %v1594_v22  ;;  %v1600_v41 = vsub.f32 %v3363_v16, %v3542_v49 }
 0x2df   : > { %1926 = vxpose.xlu1.b32.cont [4/16] (narrow) %v1846_v37, 8  ;;  %1894 = vxpose.xlu0.b32.cont [4/16] (narrow) %v1830_v63, 8  ;;  %v1848_v1 = vsel %vm1720_vm10, %v1656_v10, %v1784_v34  ;;  %v1832_v8 = vsel %vm1704_vm11, %v1640_v19, %v1768_v38  ;;  %v1769_v31 = vmul.f32 0.01, %v1641_v28  ;;  %v1642_v23 = vmul.f32 %v3558_v29, %v1578_v43  ;;  %v4108_v38 = vld [vmem:[#allocation16_spill] sm:$0xff] }
 0x2e0   : > { %vm1705_vm13 = vcmp.ge.f32.partialorder %v1641_v28, 0.0  ;;  %v1584_v32 = vsub.f32 %v3283_v62, %v3542_v49  ;;  %v1601_v15 = vsub.f32 %v3368_v25, %v3542_v49  ;;  %v1585_v12 = vsub.f32 %v3288_v2, %v3542_v49  ;;  %v4122_v62 = vld [vmem:[#allocation23_spill] sm:$0xff] }
 0x2e1   : > { %v1602_v4 = vsub.f32 %v3373_v33, %v3542_v49  ;;  %v1586_v7 = vsub.f32 %v3293_v6, %v3542_v49  ;;  %v1619_v26 = vsub.f32 %v3458_v3, %v3542_v49  ;;  %v1603_v60 = vsub.f32 %v3378_v40, %v3542_v49 }
 0x2e2   : > { %v1849_v44 = vsel %vm1721_vm12, %v1657_v24, %v1785_v27  ;;  %vm1722_vm14 = vcmp.ge.f32.partialorder %v1658_v21, 0.0  ;;  %v1786_v25 = vmul.f32 0.01, %v1658_v21  ;;  %v1620_v2 = vsub.f32 %v3463_v17, %v3542_v49 }
 0x2e3   : > { %1927 = vxpose.xlu1.b32.cont [5/16] (narrow) %v1847_v35, 8  ;;  %1895 = vxpose.xlu0.b32.cont [5/16] (narrow) %v1831_v36, 8  ;;  %v1833_v37 = vsel %vm1705_vm13, %v1641_v28, %v1769_v31  ;;  %v1770_v33 = vmul.f32 0.01, %v1642_v23  ;;  %v1659_v10 = vmul.f32 %v3558_v29, %v1595_v20  ;;  %v1643_v6 = vmul.f32 %v3558_v29, %v1579_v13 }
 0x2e4   : > { %vm1706_vm15 = vcmp.ge.f32.partialorder %v1642_v23, 0.0  ;;  %v3638_v3 = vmul.f32 %v3558_v29, %v1601_v15  ;;  %v3641_v40 = vmul.f32 %v3558_v29, %v1585_v12  ;;  %v1604_v18 = vsub.f32 %v3383_v47, %v3542_v49 }
 0x2e5   : > { %v3646_v63 = vmul.f32 %v3558_v29, %v1602_v4  ;;  %v3649_v17 = vmul.f32 %v3558_v29, %v1586_v7  ;;  %v1621_v30 = vsub.f32 %v3468_v39, %v3542_v49  ;;  %v1605_v14 = vsub.f32 %v3388_v55, %v3542_v49 }
 0x2e6   : > { %v1850_v19 = vsel %vm1722_vm14, %v1658_v21, %v1786_v25  ;;  %v1660_v22 = vmul.f32 %v3558_v29, %v1596_v9  ;;  %v1622_v47 = vsub.f32 %v3473_v57, %v3542_v49  ;;  %v1834_v43 = vsel %vm1706_vm15, %v1642_v23, %v1770_v33 }
 0x2e7   : > { %1928 = vxpose.xlu1.b32.cont [6/16] (narrow) %v1848_v1, 8  ;;  %1896 = vxpose.xlu0.b32.cont [6/16] (narrow) %v1832_v8, 8  ;;  %v1787_v20 = vmul.f32 0.01, %v1659_v10  ;;  %v1771_v13 = vmul.f32 0.01, %v1643_v6  ;;  %v1644_v34 = vmul.f32 %v3558_v29, %v1580_v48  ;;  %v3661_v39 = vmul.f32 %v3558_v29, %v1619_v26 }
 0x2e8   : > { %vm1723_vm0 = vcmp.ge.f32.partialorder %v1659_v10, 0.0  ;;  %vm1707_vm1 = vcmp.ge.f32.partialorder %v1643_v6, 0.0  ;;  %v3664_v55 = vmul.f32 %v3558_v29, %v1603_v60  ;;  %v3667_v24 = vmul.f32 %v3558_v29, %v1620_v2  ;;  %v4112_v60 = vld [vmem:[#allocation18_spill] sm:$0xff] }
 0x2e9   : > { %v3670_v9 = vmul.f32 %v3558_v29, %v1604_v18  ;;  %v1606_v57 = vsub.f32 %v3393_v61, %v3542_v49  ;;  %v1623_v48 = vsub.f32 %v3478_v56, %v3542_v49  ;;  %vm1724_vm2 = vcmp.ge.f32.partialorder %v1660_v22, 0.0 }
 0x2ea   : > { %v1788_v35 = vmul.f32 0.01, %v1660_v22  ;;  %v1661_v36 = vmul.f32 %v3558_v29, %v1597_v42  ;;  %v1607_v28 = vsub.f32 %v4108_v38, %v3542_v49  ;;  %v1851_v27 = vsel %vm1723_vm0, %v1659_v10, %v1787_v20 }
 0x2eb   : > { %1929 = vxpose.xlu1.b32.cont [7/16] (narrow) %v1849_v44, 8  ;;  %1897 = vxpose.xlu0.b32.cont [7/16] (narrow) %v1833_v37, 8  ;;  %v1835_v21 = vsel %vm1707_vm1, %v1643_v6, %v1771_v13  ;;  %v1772_v1 = vmul.f32 0.01, %v1644_v34  ;;  %v1645_v61 = vmul.f32 %v3558_v29, %v1581_v53  ;;  %vm1708_vm3 = vcmp.ge.f32.partialorder %v1644_v34, 0.0  ;;  %v4111_v53 = vld [vmem:[#allocation29_spill] sm:$0xff] }
 0x2ec   : > { %v3687_v56 = vmul.f32 %v3558_v29, %v1621_v30  ;;  %v3690_v8 = vmul.f32 %v3558_v29, %v1605_v14  ;;  %v1624_v42 = vsub.f32 %v4109_v0, %v3542_v49  ;;  %v3695_v31 = vmul.f32 %v3558_v29, %v1622_v47  ;;  %v4116_v47 = vld [vmem:[#allocation20_spill] sm:$0xff] }
 0x2ed   : > { %v3698_v23 = vmul.f32 %v3558_v29, %v1606_v57  ;;  %v1608_v15 = vsub.f32 %v4110_v50, %v3542_v49  ;;  %v1625_v12 = vsub.f32 %v4111_v53, %v3542_v49  ;;  %v1852_v4 = vsel %vm1724_vm2, %v1660_v22, %v1788_v35 }
 0x2ee   : > { %v1789_v7 = vmul.f32 0.01, %v1661_v36  ;;  %v1662_v26 = vmul.f32 %v3558_v29, %v1598_v52  ;;  %v1609_v44 = vsub.f32 %v4112_v60, %v3542_v49  ;;  %v1836_v25 = vsel %vm1708_vm3, %v1644_v34, %v1772_v1  ;;  %v4123_v60 = vld [vmem:[#allocation35_spill] sm:$0xff] }
 0x2ef   : > { %1930 = vxpose.xlu1.b32.cont [8/16] (narrow) %v1850_v19, 8  ;;  %1898 = vxpose.xlu0.b32.cont [8/16] (narrow) %v1834_v43, 8  ;;  %vm1725_vm4 = vcmp.ge.f32.partialorder %v1661_v36, 0.0  ;;  %v1773_v2 = vmul.f32 0.01, %v1645_v61  ;;  %v1646_v37 = vmul.f32 %v3558_v29, %v1582_v59  ;;  %vm1709_vm5 = vcmp.ge.f32.partialorder %v1645_v61, 0.0 }
 0x2f0   : > { %v3716_v33 = vmul.f32 %v3558_v29, %v1623_v48  ;;  %v3719_v10 = vmul.f32 %v3558_v29, %v1607_v28  ;;  %v1626_v52 = vsub.f32 %v4113_v5, %v3542_v49  ;;  %v3724_v6 = vmul.f32 %v3558_v29, %v1624_v42  ;;  %v4115_v59 = vld [vmem:[#allocation31_spill] sm:$0xff] }
 0x2f1   : > { %v3727_v18 = vmul.f32 %v3558_v29, %v1608_v15  ;;  %v1610_v30 = vsub.f32 %v4114_v54, %v3542_v49  ;;  %v1627_v14 = vsub.f32 %v4115_v59, %v3542_v49  ;;  %v1853_v19 = vsel %vm1725_vm4, %v1661_v36, %v1789_v7  ;;  %v4117_v36 = vld [vmem:[#allocation32_spill] sm:$0xff]  ;;  %v4121_v7 = vld [vmem:[#allocation34_spill] sm:$0xff] }
 0x2f2   : > { %vm1726_vm6 = vcmp.ge.f32.partialorder %v1662_v26, 0.0  ;;  %v1790_v22 = vmul.f32 0.01, %v1662_v26  ;;  %v1611_v43 = vsub.f32 %v4116_v47, %v3542_v49  ;;  %v1837_v20 = vsel %vm1709_vm5, %v1645_v61, %v1773_v2  ;;  %v4120_v61 = vld [vmem:[#allocation22_spill] sm:$0xff] }
 0x2f3   : > { %1931 = vxpose.xlu1.b32.cont [9/16] (narrow) %v1851_v27, 8  ;;  %1899 = vxpose.xlu0.b32.cont [9/16] (narrow) %v1835_v21, 8  ;;  %v1774_v13 = vmul.f32 0.01, %v1646_v37  ;;  %v1663_v34 = vmul.f32 %v3558_v29, %v1599_v46  ;;  %v1647_v57 = vmul.f32 %v3558_v29, %v1583_v45  ;;  %vm1710_vm7 = vcmp.ge.f32.partialorder %v1646_v37, 0.0  ;;  %v4119_v45 = vld [vmem:[#allocation33_spill] sm:$0xff] }
 0x2f4   : > { %v3744_v48 = vmul.f32 %v3558_v29, %v1625_v12  ;;  %v3747_v35 = vmul.f32 %v3558_v29, %v1609_v44  ;;  %v1628_v38 = vsub.f32 %v4117_v36, %v3542_v49  ;;  %v3752_v28 = vmul.f32 %v3558_v29, %v1626_v52 }
 0x2f5   : > { %v3755_v11 = vmul.f32 %v3558_v29, %v1610_v30  ;;  %v1612_v46 = vsub.f32 %v4118_v58, %v3542_v49  ;;  %v1629_v27 = vsub.f32 %v4119_v45, %v3542_v49  ;;  %v1854_v21 = vsel %vm1726_vm6, %v1662_v26, %v1790_v22  ;;  %v4125_v22 = vld [vmem:[#allocation36_spill] sm:$0xff] }
 0x2f6   : > { %v1664_v1 = vmul.f32 %v3558_v29, %v1600_v41  ;;  %v1613_v0 = vsub.f32 %v4120_v61, %v3542_v49  ;;  %v1838_v42 = vsel %vm1710_vm7, %v1646_v37, %v1774_v13  ;;  %v1791_v50 = vmul.f32 0.01, %v1663_v34  ;;  %v4127_v13 = vld [vmem:[#allocation37_spill] sm:$0xff] }
 0x2f7   : > { %1932 = vxpose.xlu1.b32.cont [10/16] (narrow) %v1852_v4, 8  ;;  %1900 = vxpose.xlu0.b32.cont [10/16] (narrow) %v1836_v25, 8  ;;  %v1775_v15 = vmul.f32 0.01, %v1647_v57  ;;  %v1648_v53 = vmul.f32 %v3558_v29, %v1584_v32  ;;  %vm1727_vm8 = vcmp.ge.f32.partialorder %v1663_v34, 0.0  ;;  %vm1711_vm9 = vcmp.ge.f32.partialorder %v1647_v57, 0.0 }
 0x2f8   : > { %v3773_v12 = vmul.f32 %v3558_v29, %v1627_v14  ;;  %v3776_v16 = vmul.f32 %v3558_v29, %v1611_v43  ;;  %v3779_v41 = vmul.f32 %v3558_v29, %v1628_v38  ;;  %v3782_v4 = vmul.f32 %v3558_v29, %v1612_v46  ;;  %v4124_v25 = vld [vmem:[#allocation24_spill] sm:$0xff]  ;;  %v4126_v43 = vld [vmem:[#allocation25_spill] sm:$0xff] }
 0x2f9   : > { %v1630_v26 = vsub.f32 %v4121_v7, %v3542_v49  ;;  %v1614_v32 = vsub.f32 %v4122_v62, %v3542_v49  ;;  %v1631_v44 = vsub.f32 %v4123_v60, %v3542_v49  ;;  %v1615_v2 = vsub.f32 %v4124_v25, %v3542_v49 }
 0x2fa   : > { %v1855_v37 = vsel %vm1727_vm8, %v1663_v34, %v1791_v50  ;;  %v1839_v5 = vsel %vm1711_vm9, %v1647_v57, %v1775_v15  ;;  %v1792_v52 = vmul.f32 0.01, %v1664_v1  ;;  %v1776_v54 = vmul.f32 0.01, %v1648_v53  ;;  %v4128_v57 = vld [vmem:[#allocation26_spill] sm:$0xff] }
 0x2fb   : > { %1933 = vxpose.xlu1.b32.cont [11/16] (narrow) %v1853_v19, 8  ;;  %1901 = vxpose.xlu0.b32.cont [11/16] (narrow) %v1837_v20, 8  ;;  %vm1728_vm10 = vcmp.ge.f32.partialorder %v1664_v1, 0.0  ;;  %vm1712_vm11 = vcmp.ge.f32.partialorder %v1648_v53, 0.0  ;;  %v3793_v30 = vmul.f32 %v3558_v29, %v1629_v27  ;;  %v3796_v59 = vmul.f32 %v3558_v29, %v1613_v0 }
 0x2fc   : > { %v3799_v14 = vmul.f32 %v3558_v29, %v1630_v26  ;;  %v3802_v19 = vmul.f32 %v3558_v29, %v1614_v32  ;;  %v1632_v47 = vsub.f32 %v4125_v22, %v3542_v49  ;;  %v1616_v20 = vsub.f32 %v4126_v43, %v3542_v49 }
 0x2fd   : > { %v1633_v34 = vsub.f32 %v4127_v13, %v3542_v49  ;;  %v1617_v36 = vsub.f32 %v4128_v57, %v3542_v49  ;;  %v1856_v38 = vsel %vm1728_vm10, %v1664_v1, %v1792_v52  ;;  %v1840_v58 = vsel %vm1712_vm11, %v1648_v53, %v1776_v54 }
 0x2fe   : > { %v1793_v46 = vmul.f32 0.01, %v3638_v3  ;;  %v1777_v45 = vmul.f32 0.01, %v3641_v40  ;;  %vm1729_vm12 = vcmp.ge.f32.partialorder %v3638_v3, 0.0  ;;  %vm1713_vm13 = vcmp.ge.f32.partialorder %v3641_v40, 0.0 }
 0x2ff   : > { %1934 = vxpose.xlu1.b32.cont [12/16] (narrow) %v1854_v21, 8  ;;  %1902 = vxpose.xlu0.b32.cont [12/16] (narrow) %v1838_v42, 8  ;;  %v3817_v27 = vmul.f32 %v3558_v29, %v1631_v44  ;;  %v3820_v21 = vmul.f32 %v3558_v29, %v1615_v2  ;;  %v3823_v61 = vmul.f32 %v3558_v29, %v1632_v47  ;;  %v4129_v42 = vld [vmem:[#allocation27_spill] sm:$0xff]  ;;  %v1794_v7 = vmul.f32 0.01, %v3646_v63 }
 0x300   : > { %v3826_v1 = vmul.f32 %v3558_v29, %v1616_v20  ;;  %v1634_v0 = vsub.f32 %v3533_v51, %v3542_v49  ;;  %v1618_v50 = vsub.f32 %v4129_v42, %v3542_v49  ;;  %v1857_v15 = vsel %vm1729_vm12, %v3638_v3, %v1793_v46 }
 0x301   : > { %v1841_v53 = vsel %vm1713_vm13, %v3641_v40, %v1777_v45  ;;  %v1778_v26 = vmul.f32 0.01, %v3649_v17  ;;  %vm1730_vm14 = vcmp.ge.f32.partialorder %v3646_v63, 0.0  ;;  %vm1714_vm15 = vcmp.ge.f32.partialorder %v3649_v17, 0.0 }
 0x302   : > { %v3839_v62 = vmul.f32 %v3558_v29, %v1633_v34  ;;  %v3842_v51 = vmul.f32 %v3558_v29, %v1617_v36  ;;  %v3845_v49 = vmul.f32 %v3558_v29, %v1634_v0  ;;  %v3848_v3 = vmul.f32 %v3558_v29, %v1618_v50 }
 0x303   : > { %1935 = vxpose.xlu1.b32.cont [13/16] (narrow) %v1855_v37, 8  ;;  %1903 = vxpose.xlu0.b32.cont [13/16] (narrow) %v1839_v5, 8  ;;  %v1858_v40 = vsel %vm1730_vm14, %v3646_v63, %v1794_v7  ;;  %v1842_v32 = vsel %vm1714_vm15, %v3649_v17, %v1778_v26  ;;  %v1811_v60 = vmul.f32 0.01, %v3661_v39  ;;  %v1795_v44 = vmul.f32 0.01, %v3664_v55 }
 0x304   : > { %vm1747_vm0 = vcmp.ge.f32.partialorder %v3661_v39, 0.0  ;;  %vm1731_vm1 = vcmp.ge.f32.partialorder %v3664_v55, 0.0  ;;  %v1812_v2 = vmul.f32 0.01, %v3667_v24  ;;  %v1796_v63 = vmul.f32 0.01, %v3670_v9 }
 0x305   : > { %v1875_v25 = vsel %vm1747_vm0, %v3661_v39, %v1811_v60  ;;  %v1859_v29 = vsel %vm1731_vm1, %v3664_v55, %v1795_v44  ;;  %vm1748_vm2 = vcmp.ge.f32.partialorder %v3667_v24, 0.0  ;;  %vm1732_vm3 = vcmp.ge.f32.partialorder %v3670_v9, 0.0 }
 0x306   : > { %v1876_v17 = vsel %vm1748_vm2, %v3667_v24, %v1812_v2  ;;  %v1860_v37 = vsel %vm1732_vm3, %v3670_v9, %v1796_v63  ;;  %v1813_v5 = vmul.f32 0.01, %v3687_v56  ;;  %v1797_v39 = vmul.f32 0.01, %v3690_v8 }
 0x307   : > { %1936 = vxpose.xlu1.b32.cont [14/16] (narrow) %v1856_v38, 8  ;;  %1904 = vxpose.xlu0.b32.cont [14/16] (narrow) %v1840_v58, 8  ;;  %vm1749_vm4 = vcmp.ge.f32.partialorder %v3687_v56, 0.0  ;;  %vm1733_vm5 = vcmp.ge.f32.partialorder %v3690_v8, 0.0  ;;  %v1814_v54 = vmul.f32 0.01, %v3695_v31 }
 0x308   : > { %v1877_v55 = vsel %vm1749_vm4, %v3687_v56, %v1813_v5  ;;  %v1861_v52 = vsel %vm1733_vm5, %v3690_v8, %v1797_v39  ;;  %v1798_v24 = vmul.f32 0.01, %v3698_v23  ;;  %vm1750_vm6 = vcmp.ge.f32.partialorder %v3695_v31, 0.0 }
 0x309   : > { %vm1734_vm7 = vcmp.ge.f32.partialorder %v3698_v23, 0.0  ;;  %v1878_v9 = vsel %vm1750_vm6, %v3695_v31, %v1814_v54  ;;  %v1815_v47 = vmul.f32 0.01, %v3716_v33  ;;  %v1799_v56 = vmul.f32 0.01, %v3719_v10 }
 0x30a   : > { %v1862_v22 = vsel %vm1734_vm7, %v3698_v23, %v1798_v24  ;;  %vm1751_vm8 = vcmp.ge.f32.partialorder %v3716_v33, 0.0  ;;  %vm1735_vm9 = vcmp.ge.f32.partialorder %v3719_v10, 0.0  ;;  %v1816_v20 = vmul.f32 0.01, %v3724_v6 }
 0x30b   : > { %1937 = vxpose.xlu1.b32.cont [15/16] (narrow) %v1857_v15, 8  ;;  %1905 = vxpose.xlu0.b32.cont [15/16] (narrow) %v1841_v53, 8  ;;  %v1879_v8 = vsel %vm1751_vm8, %v3716_v33, %v1815_v47  ;;  %v1863_v43 = vsel %vm1735_vm9, %v3719_v10, %v1799_v56  ;;  %v1800_v31 = vmul.f32 0.01, %v3727_v18  ;;  %vm1752_vm10 = vcmp.ge.f32.partialorder %v3724_v6, 0.0 }
 0x30c   : > { %vm1736_vm11 = vcmp.ge.f32.partialorder %v3727_v18, 0.0  ;;  %v1880_v23 = vsel %vm1752_vm10, %v3724_v6, %v1816_v20  ;;  %v1817_v34 = vmul.f32 0.01, %v3744_v48  ;;  %v1801_v33 = vmul.f32 0.01, %v3747_v35 }
 0x30d   : > { %v1864_v13 = vsel %vm1736_vm11, %v3727_v18, %v1800_v31  ;;  %vm1753_vm12 = vcmp.ge.f32.partialorder %v3744_v48, 0.0  ;;  %vm1737_vm13 = vcmp.ge.f32.partialorder %v3747_v35, 0.0  ;;  %v1818_v36 = vmul.f32 0.01, %v3752_v28 }
 0x30e   : > { %v1881_v10 = vsel %vm1753_vm12, %v3744_v48, %v1817_v34  ;;  %v1865_v57 = vsel %vm1737_vm13, %v3747_v35, %v1801_v33  ;;  %v1802_v6 = vmul.f32 0.01, %v3755_v11  ;;  %vm1754_vm14 = vcmp.ge.f32.partialorder %v3752_v28, 0.0 }
 0x30f   : > { %1938 = vxpose.xlu1.b32.end [16/16] (narrow) %v1858_v40, 8  ;;  %1906 = vxpose.xlu0.b32.end [16/16] (narrow) %v1842_v32, 8  ;;  %vm1738_vm15 = vcmp.ge.f32.partialorder %v3755_v11, 0.0  ;;  %v1882_v18 = vsel %vm1754_vm14, %v3752_v28, %v1818_v36  ;;  %v1819_v58 = vmul.f32 0.01, %v3773_v12  ;;  %vm1755_vm0 = vcmp.ge.f32.partialorder %v3773_v12, 0.0 }
 0x310   : > { %v1866_v38 = vsel %vm1738_vm15, %v3755_v11, %v1802_v6  ;;  %v1803_v48 = vmul.f32 0.01, %v3776_v16  ;;  %vm1739_vm1 = vcmp.ge.f32.partialorder %v3776_v16, 0.0  ;;  %v1820_v45 = vmul.f32 0.01, %v3779_v41 }
 0x311   : > { %v1883_v35 = vsel %vm1755_vm0, %v3773_v12, %v1819_v58  ;;  %v1804_v28 = vmul.f32 0.01, %v3782_v4  ;;  %vm1756_vm2 = vcmp.ge.f32.partialorder %v3779_v41, 0.0  ;;  %vm1740_vm3 = vcmp.ge.f32.partialorder %v3782_v4, 0.0 }
 0x312   : > { %v1867_v46 = vsel %vm1739_vm1, %v3776_v16, %v1803_v48  ;;  %v1884_v11 = vsel %vm1756_vm2, %v3779_v41, %v1820_v45  ;;  %v1821_v42 = vmul.f32 0.01, %v3793_v30  ;;  %v1805_v12 = vmul.f32 0.01, %v3796_v59 }
 0x313   : > { %1987 = vxpose.xlu1.b32.start [1/16] (narrow) %v1875_v25, 8  ;;  %1955 = vxpose.xlu0.b32.start [1/16] (narrow) %v1859_v29, 8  ;;  %v1868_v0 = vsel %vm1740_vm3, %v3782_v4, %v1804_v28  ;;  %vm1757_vm4 = vcmp.ge.f32.partialorder %v3793_v30, 0.0  ;;  %vm1741_vm5 = vcmp.ge.f32.partialorder %v3796_v59, 0.0  ;;  %v1822_v15 = vmul.f32 0.01, %v3799_v14 }
 0x314   : > { %v1885_v16 = vsel %vm1757_vm4, %v3793_v30, %v1821_v42  ;;  %v1869_v50 = vsel %vm1741_vm5, %v3796_v59, %v1805_v12  ;;  %v1806_v41 = vmul.f32 0.01, %v3802_v19  ;;  %vm1758_vm6 = vcmp.ge.f32.partialorder %v3799_v14, 0.0 }
 0x315   : > { %vm1742_vm7 = vcmp.ge.f32.partialorder %v3802_v19, 0.0  ;;  %v1886_v4 = vsel %vm1758_vm6, %v3799_v14, %v1822_v15  ;;  %v1823_v7 = vmul.f32 0.01, %v3817_v27  ;;  %v1807_v30 = vmul.f32 0.01, %v3820_v21 }
 0x316   : > { %v1870_v53 = vsel %vm1742_vm7, %v3802_v19, %v1806_v41  ;;  %vm1759_vm8 = vcmp.ge.f32.partialorder %v3817_v27, 0.0  ;;  %vm1743_vm9 = vcmp.ge.f32.partialorder %v3820_v21, 0.0  ;;  %v1824_v40 = vmul.f32 0.01, %v3823_v61 }
 0x317   : > { %1988 = vxpose.xlu1.b32.cont [2/16] (narrow) %v1876_v17, 8  ;;  %1956 = vxpose.xlu0.b32.cont [2/16] (narrow) %v1860_v37, 8  ;;  %v1887_v59 = vsel %vm1759_vm8, %v3817_v27, %v1823_v7  ;;  %v1871_v26 = vsel %vm1743_vm9, %v3820_v21, %v1807_v30  ;;  %v1808_v14 = vmul.f32 0.01, %v3826_v1  ;;  %vm1760_vm10 = vcmp.ge.f32.partialorder %v3823_v61, 0.0 }
 0x318   : > { %vm1744_vm11 = vcmp.ge.f32.partialorder %v3826_v1, 0.0  ;;  %v1888_v19 = vsel %vm1760_vm10, %v3823_v61, %v1824_v40  ;;  %v1825_v60 = vmul.f32 0.01, %v3839_v62  ;;  %v1809_v27 = vmul.f32 0.01, %v3842_v51 }
 0x319   : > { %v1872_v32 = vsel %vm1744_vm11, %v3826_v1, %v1808_v14  ;;  %vm1761_vm12 = vcmp.ge.f32.partialorder %v3839_v62, 0.0  ;;  %vm1745_vm13 = vcmp.ge.f32.partialorder %v3842_v51, 0.0  ;;  %v1826_v61 = vmul.f32 0.01, %v3845_v49 }
 0x31a   : > { %v1889_v21 = vsel %vm1761_vm12, %v3839_v62, %v1825_v60  ;;  %v1873_v44 = vsel %vm1745_vm13, %v3842_v51, %v1809_v27  ;;  %v1810_v1 = vmul.f32 0.01, %v3848_v3  ;;  %vm1762_vm14 = vcmp.ge.f32.partialorder %v3845_v49, 0.0 }
 0x31b   : > { %1989 = vxpose.xlu1.b32.cont [3/16] (narrow) %v1877_v55, 8  ;;  %1957 = vxpose.xlu0.b32.cont [3/16] (narrow) %v1861_v52, 8  ;;  %vm1746_vm15 = vcmp.ge.f32.partialorder %v3848_v3, 0.0  ;;  %v1890_v25 = vsel %vm1762_vm14, %v3845_v49, %v1826_v61 }
 0x31c   : > { %v1874_v29 = vsel %vm1746_vm15, %v3848_v3, %v1810_v1 }
 0x31f   : > { %1990 = vxpose.xlu1.b32.cont [4/16] (narrow) %v1878_v9, 8  ;;  %1958 = vxpose.xlu0.b32.cont [4/16] (narrow) %v1862_v22, 8 }
 0x323   : > { %1991 = vxpose.xlu1.b32.cont [5/16] (narrow) %v1879_v8, 8  ;;  %1959 = vxpose.xlu0.b32.cont [5/16] (narrow) %v1863_v43, 8 }
 0x327   : > { %1992 = vxpose.xlu1.b32.cont [6/16] (narrow) %v1880_v23, 8  ;;  %1960 = vxpose.xlu0.b32.cont [6/16] (narrow) %v1864_v13, 8 }
 0x32b   : > { %1993 = vxpose.xlu1.b32.cont [7/16] (narrow) %v1881_v10, 8  ;;  %1961 = vxpose.xlu0.b32.cont [7/16] (narrow) %v1865_v57, 8 }
 0x32f   : > { %1994 = vxpose.xlu1.b32.cont [8/16] (narrow) %v1882_v18, 8  ;;  %1962 = vxpose.xlu0.b32.cont [8/16] (narrow) %v1866_v38, 8 }
 0x333   : > { %1995 = vxpose.xlu1.b32.cont [9/16] (narrow) %v1883_v35, 8  ;;  %1963 = vxpose.xlu0.b32.cont [9/16] (narrow) %v1867_v46, 8 }
 0x337   : > { %1996 = vxpose.xlu1.b32.cont [10/16] (narrow) %v1884_v11, 8  ;;  %1964 = vxpose.xlu0.b32.cont [10/16] (narrow) %v1868_v0, 8 }
 0x33b   : > { %1997 = vxpose.xlu1.b32.cont [11/16] (narrow) %v1885_v16, 8  ;;  %1965 = vxpose.xlu0.b32.cont [11/16] (narrow) %v1869_v50, 8 }
 0x33f   : > { %1998 = vxpose.xlu1.b32.cont [12/16] (narrow) %v1886_v4, 8  ;;  %1966 = vxpose.xlu0.b32.cont [12/16] (narrow) %v1870_v53, 8 }
 0x343   : > { %1999 = vxpose.xlu1.b32.cont [13/16] (narrow) %v1887_v59, 8  ;;  %1967 = vxpose.xlu0.b32.cont [13/16] (narrow) %v1871_v26, 8 }
 0x347   : > { %2000 = vxpose.xlu1.b32.cont [14/16] (narrow) %v1888_v19, 8  ;;  %1968 = vxpose.xlu0.b32.cont [14/16] (narrow) %v1872_v32, 8 }
 0x34b   : > { %2001 = vxpose.xlu1.b32.cont [15/16] (narrow) %v1889_v21, 8  ;;  %1969 = vxpose.xlu0.b32.cont [15/16] (narrow) %v1873_v44, 8 }
 0x34f   : > { %2002 = vxpose.xlu1.b32.end [16/16] (narrow) %v1890_v25, 8  ;;  %1970 = vxpose.xlu0.b32.end [16/16] (narrow) %v1874_v29, 8 }
 0x353   : > { %v1939_v62 = vpop.trf.xlu1  ;;  %v1907_v51 = vpop.trf.xlu0 }
 0x354   : > { %2020 = vst [vmem:[%s3042_s30 + $0x8] sm:$0xff] %v1939_v62  ;;  %2019 = vst [vmem:[%s3042_s30] sm:$0xff] %v1907_v51 }
 0x393   : > { %v2003_v2 = vpop.trf.xlu1  ;;  %v1971_v63 = vpop.trf.xlu0 }
 0x394   : > { %2022 = vst [vmem:[%s3042_s30 + $0x18] sm:$0xff] %v2003_v2  ;;  %2021 = vst [vmem:[%s3042_s30 + $0x10] sm:$0xff] %v1971_v63 }
 0x395 PF: > { %s4130_s3 = sld [smem:[#allocation13_spill]]  ;;  %s4131_s12 = sld [smem:[#allocation39_spill]] }
 0x396   : > { %s2040_s27 = sshll.u32 %s3042_s30, 4  ;;  %s2024_s4 = scalar_lea.sflag [#allocation5], %s227_s18  ;;  %s2041_s27 = int_to_ptr.vmem [resolvable:$true] %s2040_s27 }
 0x397   : > { %s2603_s29 = scalar_lea.vmem %s2041_s27, 512  ;;  %p4133_p0 = scmp.ne.s32.totalorder %s4078_s15, 0 }
 0x398   : > { %p2604_p12 = scmp.ne.s32.totalorder %s2041_s27, %s2603_s29  ;;  %s2764_s24 = smov [#allocation8]  }
 0x399   : > { %s2607_s26 = sshll.u32 %s2764_s24, 4  ;;  %s2608_s26 = int_to_ptr.vmem [resolvable:$false] %s2607_s26 }
 0x39a   : > { %p2605_p10 = pnand %p2604_p12, %p4133_p0  ;;  %s2609_s0 = scalar_lea.vmem %s2608_s26, 1024 }
 0x39b   : > { %s2258_s28 = sshll.u32 %s4130_s3, 9  ;;  %s4132_s7 = smov %s4131_s12 }
 0x39c   : > { %s3956_s19 = scalar_lea.hbm %s4131_s12, %s2258_s28  ;;  %p2606_p3 = pneg %p2605_p10 }
 0x39d   : > { %p2610_p6 = scmp.lt.s32.totalorder %s2041_s27, %s2608_s26  ;;  %p2611_p9 = scmp.lt.s32.totalorder %s2609_s0, %s2603_s29 }
 0x39f   : > { %p2612_p1 = por %p2611_p9, %p2610_p6 }
 0x3a1   : > { %p2613_p11 = pnand %p2612_p1, %p2606_p3 }
 0x3a3   : > { %2616 = shalt.err (!%p2613_p11)
}
 0x3a4   : > { %s2617_s18 = scalar_lea.hbm %s3956_s19, 512  ;;  %s2621_s28 = scalar_lea.hbm %s4132_s7, 1024 }
 0x3a5   : > { %p2618_p4 = scmp.ne.s32.totalorder %s3956_s19, %s2617_s18  ;;  %p2622_p5 = scmp.lt.u32.totalorder %s3956_s19, %s4132_s7 }
 0x3a6   : > { %p2623_p13 = scmp.lt.u32.totalorder %s2621_s28, %s2617_s18  ;;  %p2625_p12 = scmp.lt.u32.totalorder %s2617_s18, %s3956_s19 }
 0x3a7   : > { %p2619_p2 = pnand %p2618_p4, %p4133_p0 }
 0x3a8   : > { %p2624_p7 = por %p2623_p13, %p2622_p5 }
 0x3a9   : > { %p2620_p8 = pneg %p2619_p2 }
 0x3aa   : > { %p2626_p10 = por %p2625_p12, %p2624_p7 }
 0x3ac   : > { %p2627_p3 = pnand %p2626_p10, %p2620_p8 }
 0x3ae   : > { %2630 = shalt.err (!%p2627_p3)
}
 0x3af   : > { %2295 = dma.vmem_to_hbm [thread:$0]  (%p4133_p0), %s2041_s27, 512, %s3956_s19, %s2024_s4  }
 0x3b0 PF: > { %p2309_p6 = scmp.ge.s32.totalorder %s2753_s22, 2  ;;  %s2052_s0 = sand.u32 1, %s2701_s9  }
 0x3b1   : > { %p4134_p9 = scmp.ne.s32.totalorder %s4079_s23, 0  ;;  %s2053_s12 = scalar_lea.sflag [#allocation5], %s2052_s0 }
 0x3b3   : > { %p2305_p1 = pnand %p2309_p6, %p4134_p9 }
 0x3b5   : > { %2696 = dma.done.wait (!%p2305_p1), %s2053_s12, 512  }
 0x3b6   : > { %2698 = vsyncadd (!%p2305_p1), %s2053_s12, 4294966784  ;;  %s21_s22 = sadd.s32 1, %s2753_s22   ;;  %s4136_s23 = sld [smem:[#allocation14_spill]] }
 0x3b7   : > { %p3983_p11 = scmp.ge.s32.totalorder %s21_s22, 6   ;;  %s4137_s27 = sld [smem:[#allocation15_spill]] }
 0x3b8   : > { %s4138_s9 = smov %s2705_s10  ;;  %s4139_s10 = smov %s2709_s11 }
 0x3b9   : > { %s4140_s11 = smov %s2880_s5  ;;  %s4141_s12 = smov %s2717_s13 }
 0x3ba   : > { %s4142_s13 = smov %s2721_s14  ;;  %s4143_s14 = smov %s2954_s2 }
 0x3bb   : > { %s4144_s15 = smov %s2729_s16  ;;  %s4145_s16 = smov %s2733_s17 }
 0x3bc   : > { %s4146_s17 = smov %s2883_s6  ;;  %s4147_s18 = smov %s2745_s20 }
 0x3bd   : > { %s4148_s19 = smov %s2749_s21  ;;  %s4149_s20 = smov %s4136_s23 }
 0x3be   : > { %s4150_s21 = smov %s4137_s27  ;;  %20 = sbr.rel (!%p3983_p11) target bundleno = 15 (0xf), region = 94 }
 0x3c5   :  { %2058 = vsyncpa [#allocation4], 1 }
 0x3c6   :  { %2060 = vsyncpa [#allocation4 + $0x1], 1 }
 0x3c7   :  { %2061 = vsyncpa [#allocation7], 1 }
 0x3c8   :  { %2063 = vsyncpa [#allocation7 + $0x1], 1 }
 0x3c9   :  { %2064 = vsyncpa [#allocation5], 1 }
 0x3ca   :  { %2066 = vsyncpa [#allocation5 + $0x1], 1 }

</bundles_post_ra>
